<compile_context>
chip_gen: v5e
topology: v5e:2x2
jax: 0.10.0
libtpu: 0.0.40
codegen_flags: <defaults>
</compile_context>

<pallas_src>
import jax
import jax.numpy as jnp
import numpy as np
from jax import lax
from jax.experimental import pallas as pl
from jax.experimental.pallas import tpu as pltpu  # noqa: F401  (TPU backend)

# --- small, module-consistent config ---
BATCH = 2
HIDDEN_SIZE = 32          # config.hidden_size (small test size)
NUM_LABELS = 6            # AccentModule default
# Fixed layer widths from the module definition:
C1, C2, C3 = 768, 512, 256            # classifier fc1/fc2/fc3
R1, R2, R3 = 128, 32, 1               # regressor fc1/fc2/fc3
LOGIT_PAD = 128                       # lanes reserved for logits in fused head
HEAD_W = LOGIT_PAD + R1               # 256: fused [output_layer | regressor.fc1]
SMALLS_ROWS, SMALLS_W = 8, C1         # packed biases / rw3 row


def accent_module_kernel(
    x_ref,                                  # (B, H)        f32
    w1_ref, w2_ref, w3_ref,                 # bf16 weights [in, out]
    whead_ref,                              # (256, 256)    bf16 fused head
    rw2_ref,                                # (128, 32)     bf16
    smalls_ref,                             # (8, 768)      f32 packed biases/rw3
    slab_ref,                               # (B, 128)      f32: logits | intensity
    feat_ref,                               # (B, 256)      f32 accent_feature
):
    x = x_ref[...]                                                      # (B, H)

    # Packed small params (static ref slices -> zero-cost views, single DMA).
    b1 = smalls_ref[0:1, :C1]                                           # (1, 768)
    b2 = smalls_ref[1:2, :C2]                                           # (1, 512)
    b3 = smalls_ref[2:3, :C3]                                           # (1, 256)
    bhead = smalls_ref[3:4, :HEAD_W]                                    # (1, 256)
    rb2 = smalls_ref[4:5, :R2]                                          # (1, 32)
    rw3 = smalls_ref[5:6, :R2]                                          # (1, 32)
    rb3 = smalls_ref[6:7, 0:1]                                          # (1, 1)

    # --- AccentClassifier (dropout = identity in eval mode) ---
    h = jnp.maximum(
        jnp.dot(x, w1_ref[...], preferred_element_type=jnp.float32) + b1, 0.0)    # (B, 768)
    h = jnp.maximum(
        jnp.dot(h, w2_ref[...], preferred_element_type=jnp.float32) + b2, 0.0)    # (B, 512)
    feat = jnp.maximum(
        jnp.dot(h, w3_ref[...], preferred_element_type=jnp.float32) + b3, 0.0)    # (B, 256)

    # Fused head: [output_layer (no relu) | regressor.fc1 (relu)] in one matmul.
    head = jnp.dot(feat, whead_ref[...], preferred_element_type=jnp.float32) + bhead
    logits_pad = head[:, :LOGIT_PAD]                    # (B, 128): lanes 0:6 = logits
    r = jnp.maximum(head[:, LOGIT_PAD:], 0.0)           # (B, 128): regressor r1

    # --- AccentRegressor tail ---
    r = jnp.maximum(
        jnp.dot(r, rw2_ref[...], preferred_element_type=jnp.float32) + rb2, 0.0)  # (B, 32)
    # fc3 (32 -> 1) as a VPU multiply + lane reduction instead of an N=1 MXU pass.
    intensity = jnp.maximum(
        jnp.sum(r * rw3, axis=-1, keepdims=True) + rb3, 0.0)                      # (B, 1)

    # Lane-dense combined output: logits in lanes 0:6, intensity in lane 6.
    lane = lax.broadcasted_iota(jnp.int32, logits_pad.shape, 1)
    slab_ref[...] = jnp.where(lane == NUM_LABELS, intensity, logits_pad)
    feat_ref[...] = feat


def accent_module_forward(input_feature, packed):
    """input_feature: (B, hidden_size) float32. Returns (logits, intensity, feature)."""
    B = input_feature.shape[0]

    flops = 2 * B * (HIDDEN_SIZE * C1 + C1 * C2 + C2 * C3
                     + C3 * HEAD_W + LOGIT_PAD * R2 + R2)
    weight_args = (packed["w1"], packed["w2"], packed["w3"],
                   packed["w_head"], packed["rw2"], packed["smalls"])
    bytes_accessed = int(
        sum(a.size * a.dtype.itemsize for a in weight_args)
        + input_feature.size * input_feature.dtype.itemsize
        + B * (LOGIT_PAD + C3) * 4)

    # Single invocation (no grid): whole working set (~1.3 MB) lives in VMEM,
    # each array DMA'd exactly once.
    slab, feat = pl.pallas_call(
        accent_module_kernel,
        out_shape=(
            jax.ShapeDtypeStruct((B, LOGIT_PAD), jnp.float32),
            jax.ShapeDtypeStruct((B, C3), jnp.float32),
        ),
        cost_estimate=pl.CostEstimate(
            flops=flops, transcendentals=0, bytes_accessed=bytes_accessed),
    )(input_feature, *weight_args)

    logits = slab[:, :NUM_LABELS]
    intensity = slab[:, NUM_LABELS:NUM_LABELS + 1]
    return logits, intensity, feat


def init_params(key):
    """f32 parameters, weights pre-transposed to [in_features, out_features]."""
    ks = jax.random.split(key, 7)
    scale = 0.05

    def lin(k, fan_in, fan_out):
        kw, kb = jax.random.split(k)
        w = jax.random.normal(kw, (fan_in, fan_out), jnp.float32) * scale
        b = jax.random.normal(kb, (1, fan_out), jnp.float32) * scale
        return w, b

    w1, b1 = lin(ks[0], HIDDEN_SIZE, C1)
    w2, b2 = lin(ks[1], C1, C2)
    w3, b3 = lin(ks[2], C2, C3)
    wo, bo = lin(ks[3], C3, NUM_LABELS)
    rw1, rb1 = lin(ks[4], C3, R1)
    rw2, rb2 = lin(ks[5], R1, R2)
    rw3, rb3 = lin(ks[6], R2, R3)
    return {
        "w1": w1, "b1": b1, "w2": w2, "b2": b2, "w3": w3, "b3": b3,
        "wo": wo, "bo": bo,
        "rw1": rw1, "rb1": rb1, "rw2": rw2, "rb2": rb2, "rw3": rw3, "rb3": rb3,
    }


def pack_params(p):
    """bf16 big weights, fused head weight, and one packed f32 'smalls' array."""
    bf16 = jnp.bfloat16

    # Fused head: columns 0:6 = output_layer, 6:128 = zero pad, 128:256 = regressor fc1.
    w_head = jnp.zeros((C3, HEAD_W), jnp.float32)
    w_head = w_head.at[:, :NUM_LABELS].set(p["wo"])
    w_head = w_head.at[:, LOGIT_PAD:].set(p["rw1"])

    smalls = jnp.zeros((SMALLS_ROWS, SMALLS_W), jnp.float32)
    smalls = smalls.at[0, :C1].set(p["b1"][0])
    smalls = smalls.at[1, :C2].set(p["b2"][0])
    smalls = smalls.at[2, :C3].set(p["b3"][0])
    smalls = smalls.at[3, :NUM_LABELS].set(p["bo"][0])          # head bias: logits part
    smalls = smalls.at[3, LOGIT_PAD:LOGIT_PAD + R1].set(p["rb1"][0])  # head bias: r1 part
    smalls = smalls.at[4, :R2].set(p["rb2"][0])
    smalls = smalls.at[5, :R2].set(p["rw3"][:, 0])               # fc3 weight as a row
    smalls = smalls.at[6, 0].set(p["rb3"][0, 0])

    return {
        "w1": p["w1"].astype(bf16),
        "w2": p["w2"].astype(bf16),
        "w3": p["w3"].astype(bf16),
        "w_head": w_head.astype(bf16),
        "rw2": p["rw2"].astype(bf16),
        "smalls": smalls,
    }


def reference_forward(x, p):
    """Pure-JAX reference mirroring the PyTorch AccentModule (eval mode).

    Uses the same bf16-quantized weight values (upcast to f32) as the kernel so
    the comparison isolates kernel correctness; biases stay f32.
    """
    q = lambda w: p[w].astype(jnp.bfloat16).astype(jnp.float32)
    relu = lambda v: jnp.maximum(v, 0.0)
    h = relu(x @ q("w1") + p["b1"][0])
    h = relu(h @ q("w2") + p["b2"][0])
    feat = relu(h @ q("w3") + p["b3"][0])
    logits = feat @ q("wo") + p["bo"][0]
    r = relu(feat @ q("rw1") + p["rb1"][0])
    r = relu(r @ q("rw2") + p["rb2"][0])
    intensity = relu(r @ q("rw3") + p["rb3"][0])
    return logits, intensity, feat


if __name__ == "__main__":
    key = jax.random.PRNGKey(0)
    kx, kp = jax.random.split(key)
    x = jax.random.normal(kx, (BATCH, HIDDEN_SIZE), jnp.float32)
    params = init_params(kp)
    packed = pack_params(params)

    logits, intensity, feat = accent_module_forward(x, packed)
    (logits, intensity, feat) = jax.block_until_ready((logits, intensity, feat))

    ref_logits, ref_intensity, ref_feat = reference_forward(x, params)
    np.testing.assert_allclose(np.asarray(logits), np.asarray(ref_logits),
                               rtol=1e-3, atol=1e-3)
    np.testing.assert_allclose(np.asarray(intensity), np.asarray(ref_intensity),
                               rtol=1e-3, atol=1e-3)
    np.testing.assert_allclose(np.asarray(feat), np.asarray(ref_feat),
                               rtol=1e-3, atol=1e-3)
    assert logits.shape == (BATCH, NUM_LABELS)
    assert intensity.shape == (BATCH, 1)
    assert feat.shape == (BATCH, C3)
    print("KERNEL_OK")
</pallas_src>

<mosaic_0001>
module attributes {stable_mosaic.version = 11 : i64} {
  func.func @accent_module_kernel(%arg0: memref<2x32xf32, #tpu.memory_space<vmem>>, %arg1: memref<32x768xbf16, #tpu.memory_space<vmem>>, %arg2: memref<768x512xbf16, #tpu.memory_space<vmem>>, %arg3: memref<512x256xbf16, #tpu.memory_space<vmem>>, %arg4: memref<256x256xbf16, #tpu.memory_space<vmem>>, %arg5: memref<128x32xbf16, #tpu.memory_space<vmem>>, %arg6: memref<8x768xf32, #tpu.memory_space<vmem>>, %arg7: memref<2x128xf32, #tpu.memory_space<vmem>>, %arg8: memref<2x256xf32, #tpu.memory_space<vmem>>) attributes {dimension_semantics = [], scalar_prefetch = 0 : i64, scratch_operands = 0 : i64, tpu.core_type = #tpu.core_type<tc>} {
    %c0 = arith.constant 0 : index
    %c0_0 = arith.constant 0 : index
    %0 = vector.load %arg0[%c0, %c0_0] : memref<2x32xf32, #tpu.memory_space<vmem>>, vector<2x32xf32>
    %c0_1 = arith.constant 0 : index
    %c0_2 = arith.constant 0 : index
    %1 = vector.load %arg6[%c0_1, %c0_2] : memref<8x768xf32, #tpu.memory_space<vmem>>, vector<1x768xf32>
    %c1 = arith.constant 1 : index
    %c0_3 = arith.constant 0 : index
    %2 = vector.load %arg6[%c1, %c0_3] : memref<8x768xf32, #tpu.memory_space<vmem>>, vector<1x512xf32>
    %c2 = arith.constant 2 : index
    %c0_4 = arith.constant 0 : index
    %3 = vector.load %arg6[%c2, %c0_4] : memref<8x768xf32, #tpu.memory_space<vmem>>, vector<1x256xf32>
    %c3 = arith.constant 3 : index
    %c0_5 = arith.constant 0 : index
    %4 = vector.load %arg6[%c3, %c0_5] : memref<8x768xf32, #tpu.memory_space<vmem>>, vector<1x256xf32>
    %c4 = arith.constant 4 : index
    %c0_6 = arith.constant 0 : index
    %5 = vector.load %arg6[%c4, %c0_6] : memref<8x768xf32, #tpu.memory_space<vmem>>, vector<1x32xf32>
    %c5 = arith.constant 5 : index
    %c0_7 = arith.constant 0 : index
    %6 = vector.load %arg6[%c5, %c0_7] : memref<8x768xf32, #tpu.memory_space<vmem>>, vector<1x32xf32>
    %c6 = arith.constant 6 : index
    %c0_8 = arith.constant 0 : index
    %7 = vector.load %arg6[%c6, %c0_8] : memref<8x768xf32, #tpu.memory_space<vmem>>, vector<1x1xf32>
    %c0_9 = arith.constant 0 : index
    %c0_10 = arith.constant 0 : index
    %8 = vector.load %arg1[%c0_9, %c0_10] : memref<32x768xbf16, #tpu.memory_space<vmem>>, vector<32x768xbf16>
    %cst = arith.constant dense<0.000000e+00> : vector<2x768xf32>
    %9 = tpu.matmul %0, %8, %cst {dimension_numbers = #tpu.dot_dimension_numbers<[1], [0], [0], [1], [0, 0, 1, 1], [], []>} : vector<2x32xf32>, vector<32x768xbf16>, vector<2x768xf32> -> vector<2x768xf32>
    %10 = vector.broadcast %1 : vector<1x768xf32> to vector<2x768xf32>
    %11 = arith.addf %9, %10 : vector<2x768xf32>
    %cst_11 = arith.constant 0.000000e+00 : f32
    %12 = vector.broadcast %cst_11 : f32 to vector<2x768xf32>
    %13 = arith.maximumf %11, %12 : vector<2x768xf32>
    %c0_12 = arith.constant 0 : index
    %c0_13 = arith.constant 0 : index
    %14 = vector.load %arg2[%c0_12, %c0_13] : memref<768x512xbf16, #tpu.memory_space<vmem>>, vector<768x512xbf16>
    %cst_14 = arith.constant dense<0.000000e+00> : vector<2x512xf32>
    %15 = tpu.matmul %13, %14, %cst_14 {dimension_numbers = #tpu.dot_dimension_numbers<[1], [0], [0], [1], [0, 0, 1, 1], [], []>} : vector<2x768xf32>, vector<768x512xbf16>, vector<2x512xf32> -> vector<2x512xf32>
    %16 = vector.broadcast %2 : vector<1x512xf32> to vector<2x512xf32>
    %17 = arith.addf %15, %16 : vector<2x512xf32>
    %cst_15 = arith.constant 0.000000e+00 : f32
    %18 = vector.broadcast %cst_15 : f32 to vector<2x512xf32>
    %19 = arith.maximumf %17, %18 : vector<2x512xf32>
    %c0_16 = arith.constant 0 : index
    %c0_17 = arith.constant 0 : index
    %20 = vector.load %arg3[%c0_16, %c0_17] : memref<512x256xbf16, #tpu.memory_space<vmem>>, vector<512x256xbf16>
    %cst_18 = arith.constant dense<0.000000e+00> : vector<2x256xf32>
    %21 = tpu.matmul %19, %20, %cst_18 {dimension_numbers = #tpu.dot_dimension_numbers<[1], [0], [0], [1], [0, 0, 1, 1], [], []>} : vector<2x512xf32>, vector<512x256xbf16>, vector<2x256xf32> -> vector<2x256xf32>
    %22 = vector.broadcast %3 : vector<1x256xf32> to vector<2x256xf32>
    %23 = arith.addf %21, %22 : vector<2x256xf32>
    %cst_19 = arith.constant 0.000000e+00 : f32
    %24 = vector.broadcast %cst_19 : f32 to vector<2x256xf32>
    %25 = arith.maximumf %23, %24 : vector<2x256xf32>
    %c0_20 = arith.constant 0 : index
    %c0_21 = arith.constant 0 : index
    %26 = vector.load %arg4[%c0_20, %c0_21] : memref<256x256xbf16, #tpu.memory_space<vmem>>, vector<256x256xbf16>
    %cst_22 = arith.constant dense<0.000000e+00> : vector<2x256xf32>
    %27 = tpu.matmul %25, %26, %cst_22 {dimension_numbers = #tpu.dot_dimension_numbers<[1], [0], [0], [1], [0, 0, 1, 1], [], []>} : vector<2x256xf32>, vector<256x256xbf16>, vector<2x256xf32> -> vector<2x256xf32>
    %28 = vector.broadcast %4 : vector<1x256xf32> to vector<2x256xf32>
    %29 = arith.addf %27, %28 : vector<2x256xf32>
    %30 = vector.extract_strided_slice %29 {offsets = [0, 0], sizes = [2, 128], strides = [1, 1]} : vector<2x256xf32> to vector<2x128xf32>
    %31 = vector.extract_strided_slice %29 {offsets = [0, 128], sizes = [2, 128], strides = [1, 1]} : vector<2x256xf32> to vector<2x128xf32>
    %cst_23 = arith.constant 0.000000e+00 : f32
    %32 = vector.broadcast %cst_23 : f32 to vector<2x128xf32>
    %33 = arith.maximumf %31, %32 : vector<2x128xf32>
    %c0_24 = arith.constant 0 : index
    %c0_25 = arith.constant 0 : index
    %34 = vector.load %arg5[%c0_24, %c0_25] : memref<128x32xbf16, #tpu.memory_space<vmem>>, vector<128x32xbf16>
    %cst_26 = arith.constant dense<0.000000e+00> : vector<2x32xf32>
    %35 = tpu.matmul %33, %34, %cst_26 {dimension_numbers = #tpu.dot_dimension_numbers<[1], [0], [0], [1], [0, 0, 1, 1], [], []>} : vector<2x128xf32>, vector<128x32xbf16>, vector<2x32xf32> -> vector<2x32xf32>
    %36 = vector.broadcast %5 : vector<1x32xf32> to vector<2x32xf32>
    %37 = arith.addf %35, %36 : vector<2x32xf32>
    %cst_27 = arith.constant 0.000000e+00 : f32
    %38 = vector.broadcast %cst_27 : f32 to vector<2x32xf32>
    %39 = arith.maximumf %37, %38 : vector<2x32xf32>
    %40 = vector.broadcast %6 : vector<1x32xf32> to vector<2x32xf32>
    %41 = arith.mulf %39, %40 : vector<2x32xf32>
    %cst_28 = arith.constant dense<0.000000e+00> : vector<2xf32>
    %42 = vector.multi_reduction <add>, %41, %cst_28 [1] : vector<2x32xf32> to vector<2xf32>
    %43 = vector.shape_cast %42 : vector<2xf32> to vector<2x1xf32>
    %44 = vector.broadcast %7 : vector<1x1xf32> to vector<2x1xf32>
    %45 = arith.addf %43, %44 : vector<2x1xf32>
    %cst_29 = arith.constant 0.000000e+00 : f32
    %46 = vector.broadcast %cst_29 : f32 to vector<2x1xf32>
    %47 = arith.maximumf %45, %46 : vector<2x1xf32>
    %48 = tpu.iota {dimensions = array<i32: 1>} : vector<2x128xi32>
    %c6_i32 = arith.constant 6 : i32
    %49 = vector.broadcast %c6_i32 : i32 to vector<2x128xi32>
    %50 = arith.cmpi eq, %48, %49 : vector<2x128xi32>
    %51 = vector.shape_cast %47 : vector<2x1xf32> to vector<2x1xf32>
    %52 = vector.broadcast %51 : vector<2x1xf32> to vector<2x128xf32>
    %53 = arith.select %50, %52, %30 : vector<2x128xi1>, vector<2x128xf32>
    %c0_30 = arith.constant 0 : index
    %c0_31 = arith.constant 0 : index
    %54 = vector.load %arg7[%c0_30, %c0_31] : memref<2x128xf32, #tpu.memory_space<vmem>>, vector<2x128xf32>
    tpu.vector_store %arg7[%c0_30, %c0_31], %53 {strides = array<i32>} : memref<2x128xf32, #tpu.memory_space<vmem>>, vector<2x128xf32>,
    %c0_32 = arith.constant 0 : index
    %c0_33 = arith.constant 0 : index
    %55 = vector.load %arg8[%c0_32, %c0_33] : memref<2x256xf32, #tpu.memory_space<vmem>>, vector<2x256xf32>
    tpu.vector_store %arg8[%c0_32, %c0_33], %25 {strides = array<i32>} : memref<2x256xf32, #tpu.memory_space<vmem>>, vector<2x256xf32>,
    return
  }
}

</mosaic_0001>

<bundles_post_ra>
// kernel: tpu_custom_call.1
= control target key start
LH: loop header
LB: loop body
LE: loop exit
PB: predicated region body
PF: predicated region fallthrough
CT: control target
= control target key end

     0   :  { %14 = vsyncpa [#allocation3], 0  ;;  %s4511_s0 = inlined_call_operand.vmem [shape: f32[2,32], index: 0, kind: input, shape index: {}]   ;;  %s4512_s1 = inlined_call_operand.hbm [shape: bf16[32,768], index: 1, kind: input, shape index: {}]   ;;  %s4513_s2 = inlined_call_operand.hbm [shape: bf16[768,512], index: 2, kind: input, shape index: {}]   ;;  %s4514_s3 = inlined_call_operand.hbm [shape: bf16[512,256], index: 3, kind: input, shape index: {}]   ;;  %s4515_s4 = inlined_call_operand.hbm [shape: bf16[256,256], index: 4, kind: input, shape index: {}]   ;;  %s4516_s5 = inlined_call_operand.vmem [shape: bf16[128,32], index: 5, kind: input, shape index: {}]   ;;  %s4517_s6 = inlined_call_operand.vmem [shape: f32[8,768], index: 6, kind: input, shape index: {}]   ;;  %s4518_s7 = inlined_call_operand.hbm [shape: f32[2,128], index: 7, kind: output, shape index: {0}]   ;;  %s4519_s8 = inlined_call_operand.hbm [shape: f32[2,256], index: 8, kind: output, shape index: {1}]  }
   0x1   :  { %15 = vsyncpa [#allocation6], 0 }
   0x2   :  { %16 = vsyncpa [#allocation9], 0 }
   0x3   :  { %17 = vsyncpa [#allocation4], 0  ;;  %s38_s29 = sshll.u32 %s4513_s2, 4  ;;  %s39_s29 = int_to_ptr.hbm [resolvable:$true] %s38_s29 }
   0x4   :  { %18 = vsyncpa [#allocation12], 0  ;;  %s4313_s30 = smov [#allocation5]   ;;  %s25_s12 = sshll.u32 %s4512_s1, 4  ;;  %s26_s12 = int_to_ptr.hbm [resolvable:$true] %s25_s12 }
   0x5   :  { %s40_s9 = sshll.u32 %s4313_s30, 4  ;;  %s4314_s13 = smov 256   ;;  %s41_s9 = int_to_ptr.vmem [resolvable:$true] %s40_s9 }
   0x6   :  { %s4315_s14 = smov 16   ;;  %s4316_s15 = smov [#allocation2]  }
   0x7   :  { %46 = dma.hbm_to_vmem [thread:$0]  %s39_s29, 24576, %s41_s9, [#allocation6], %s4314_s13, %s4314_s13, %s4315_s14  }
   0x8   :  { %s27_s16 = sshll.u32 %s4316_s15, 4  ;;  %s4317_s17 = smov 384   ;;  %s28_s16 = int_to_ptr.vmem [resolvable:$true] %s27_s16 }
   0x9   :  { %s4318_s18 = smov 24   ;;  %s51_s20 = sshll.u32 %s4514_s3, 4  ;;  %s52_s20 = int_to_ptr.hbm [resolvable:$true] %s51_s20 }
   0xa   :  { %33 = dma.hbm_to_vmem [thread:$0]  %s26_s12, 1536, %s28_s16, [#allocation3], %s4317_s17, %s4317_s17, %s4318_s18  }
   0xb   :  { %s4319_s21 = smov [#allocation7]   ;;  %s64_s24 = sshll.u32 %s4515_s4, 4  ;;  %s65_s24 = int_to_ptr.hbm [resolvable:$true] %s64_s24 }
   0xc   :  { %s53_s22 = sshll.u32 %s4319_s21, 4  ;;  %s4320_s25 = smov 128   ;;  %s54_s22 = int_to_ptr.vmem [resolvable:$true] %s53_s22 }
   0xd   :  { %s4321_s26 = smov 8   ;;  %s4322_s27 = smov [#allocation8]  }
   0xe   :  { %59 = dma.hbm_to_vmem [thread:$0]  %s52_s20, 8192, %s54_s22, [#allocation6], %s4320_s25, %s4320_s25, %s4321_s26  }
   0xf   :  { %s66_s28 = sshll.u32 %s4322_s27, 4  ;;  %s67_s28 = int_to_ptr.vmem [resolvable:$true] %s66_s28 }
  0x10   :  { %72 = dma.hbm_to_vmem [thread:$0]  %s65_s24, 4096, %s67_s28, [#allocation9], %s4320_s25, %s4320_s25, %s4321_s26  }
  0x11   :  { %4303 = dma.done.wait [#allocation3], 1536  }
  0x12   :  { %4304 = vsyncadd [#allocation3], 4294965760 }
  0x13   :  { %4305 = dma.done.wait [#allocation6], 32768  }
  0x14   :  { %4306 = vsyncadd [#allocation6], 4294934528 }
  0x15   :  { %4307 = dma.done.wait [#allocation9], 4096  }
  0x16   :  { %4308 = vsyncadd [#allocation9], 4294963200  ;;  %v2625_v0 = vld [vmem:[#allocation2 + $0x30] sm:$0xf]  ;;  %v3846_v1 = vld [vmem:[#allocation2 + $0x44] sm:$0xf0] }
  0x17   :  { %v3843_v2 = vld [vmem:[#allocation2 + $0x34] sm:$0xf]  ;;  %v2626_v3 = vor.u32 %v3846_v1, %v2625_v0  ;;  %v2627_v4 = vld [vmem:[#allocation2 + $0x48] sm:$0xf0]  ;;  %v2633_v5 = vld [vmem:[#allocation2 + $0x38] sm:$0xf] }
  0x18   :  { %v3847_v6 = vld [vmem:[#allocation2 + $0x4c] sm:$0xf0]  ;;  %v2630_v7 = vor.u32 %v3843_v2, %v2627_v4  ;;  %v2601_v9 = vld [vmem:[#allocation2] sm:$0xf]  ;;  %v3840_v10 = vld [vmem:[#allocation2 + $0x14] sm:$0xf0] }
  0x19   :  { %v2634_v8 = vor.u32 %v3847_v6, %v2633_v5  ;;  %v3837_v11 = vld [vmem:[#allocation2 + $0x4] sm:$0xf]  ;;  %202 = vmatpush.bf16.msra.mxu0 %v2626_v3  ;;  %v2602_v12 = vor.u32 %v3840_v10, %v2601_v9  ;;  %v2603_v13 = vld [vmem:[#allocation2 + $0x18] sm:$0xf0]  ;;  %v2609_v14 = vld [vmem:[#allocation2 + $0x8] sm:$0xf] }
  0x1a   :  { %v3841_v15 = vld [vmem:[#allocation2 + $0x1c] sm:$0xf0]  ;;  %214 = vmatpush.bf16.msra.mxu1 %v2630_v7  ;;  %v2606_v16 = vor.u32 %v3837_v11, %v2603_v13  ;;  %vm192_vm0 = vcmask 261120   ;;  %v3844_v18 = vld [vmem:[#allocation2 + $0x3c] sm:$0xf]  ;;  %vm2557_vm1 = vcmask 1041408  }
  0x1b   :  { %226 = vmatpush.bf16.msra.mxu3 %v2634_v8  ;;  %v2610_v17 = vor.u32 %v3841_v15, %v2609_v14  ;;  %v2635_v19 = vld [vmem:[#allocation2 + $0x50] sm:$0xf0]  ;;  %v4386_v20 = vld [vmem:[%s4511_s0] sm:$0x3]  ;;  %v3848_v23 = vld [vmem:[#allocation2 + $0x54] sm:$0xf0] }
  0x1c   :  { %v2638_v21 = vor.u32 %v3844_v18, %v2635_v19  ;;  %v2641_v22 = vld [vmem:[#allocation2 + $0x40] sm:$0xf]  ;;  %v3838_v24 = vld [vmem:[#allocation2 + $0xc] sm:$0xf]  ;;  %v2611_v26 = vld [vmem:[#allocation2 + $0x20] sm:$0xf0] }
  0x1d   :  { %v2642_v25 = vor.u32 %v3848_v23, %v2641_v22  ;;  %v3845_v27 = vld [vmem:[#allocation2 + $0x44] sm:$0xf]  ;;  %v2643_v28 = vld [vmem:[#allocation2 + $0x58] sm:$0xf0]  ;;  %203 = vmatpush.bf16.msra.mxu0 %v2602_v12  ;;  %v2617_v30 = vld [vmem:[#allocation2 + $0x10] sm:$0xf]  ;;  %v2614_v36 = vor.u32 %v3838_v24, %v2611_v26 }
  0x1e   :  { %v2646_v29 = vor.u32 %v3845_v27, %v2643_v28  ;;  %v3842_v31 = vld [vmem:[#allocation2 + $0x24] sm:$0xf0]  ;;  %v3839_v32 = vld [vmem:[#allocation2 + $0x14] sm:$0xf]  ;;  %215 = vmatpush.bf16.msra.mxu1 %v2606_v16  ;;  %v2619_v33 = vld [vmem:[#allocation2 + $0x28] sm:$0xf0] }
  0x1f   :  { %227 = vmatpush.bf16.msra.mxu3 %v2610_v17  ;;  %v2767_v34 = vld [vmem:[#allocation5 + $0xe0] sm:$0xf]  ;;  %v3879_v35 = vld [vmem:[#allocation5 + $0xec] sm:$0xf0]  ;;  %v2618_v37 = vor.u32 %v3842_v31, %v2617_v30  ;;  %v2622_v42 = vor.u32 %v3839_v32, %v2619_v33  ;;  %vm2538_vm2 = vcmask 254976   ;;  %s4324_s30 = smov [#allocation11]  }
  0x20   :  { %v2768_v38 = vor.u32 %v3879_v35, %v2767_v34  ;;  %v2895_v39 = vld [vmem:[#allocation5 + $0x1e0] sm:$0xf]  ;;  %v3911_v40 = vld [vmem:[#allocation5 + $0x1ec] sm:$0xf0]  ;;  %2647 = vmatmul.msk.f32.vlgmr.msra.gmra.mxu0 %vm192_vm0, %v4386_v20  ;;  %s2577_s9 = sshll.u32 %s4324_s30, 4  ;;  %s2579_s12 = sshll.u32 %s4519_s8, 4  ;;  %s2578_s9 = int_to_ptr.vmem [resolvable:$true] %s2577_s9  ;;  %s2580_s12 = int_to_ptr.hbm [resolvable:$true] %s2579_s12 }
  0x21   :  { %250 = vmatpush.bf16.msrb.mxu0 %v2642_v25  ;;  %v2751_v41 = vld [vmem:[#allocation5 + $0xc0] sm:$0xf]  ;;  %v2896_v43 = vor.u32 %v3911_v40, %v2895_v39  ;;  %v3875_v44 = vld [vmem:[#allocation5 + $0xcc] sm:$0xf0]  ;;  %2648 = vmatmul.msk.f32.vlgmr.msra.gmra.mxu1 %vm192_vm0, %v4386_v20  ;;  %s4325_s15 = smov [#allocation10]   ;;  %s2568_s18 = sshll.u32 %s4518_s7, 4  ;;  %s2569_s18 = int_to_ptr.hbm [resolvable:$true] %s2568_s18 }
  0x22   :  { %262 = vmatpush.bf16.msrb.mxu1 %v2646_v29  ;;  %v2879_v45 = vld [vmem:[#allocation5 + $0x1c0] sm:$0xf]  ;;  %2649 = vmatmul.msk.f32.vlgmr.msra.gmra.mxu3 %vm192_vm0, %v4386_v20  ;;  %v3907_v46 = vld [vmem:[#allocation5 + $0x1cc] sm:$0xf0]  ;;  %v2752_v49 = vor.u32 %v3875_v44, %v2751_v41  ;;  %s2566_s16 = sshll.u32 %s4325_s15, 4  ;;  %s2567_s16 = int_to_ptr.vmem [resolvable:$true] %s2566_s16 }
  0x23   :  { %238 = vmatpush.bf16.msrb.mxu3 %v2638_v21  ;;  %v3023_v47 = vld [vmem:[#allocation5 + $0x2e0] sm:$0xf]  ;;  %v3943_v48 = vld [vmem:[#allocation5 + $0x2ec] sm:$0xf0]  ;;  %1435 = vmatpush.bf16.msra.mxu2 %v2768_v38  ;;  %v2880_v55 = vor.u32 %v3907_v46, %v2879_v45 }
  0x24   :  { %v3024_v50 = vor.u32 %v3943_v48, %v3023_v47  ;;  %v2735_v51 = vld [vmem:[#allocation5 + $0xa0] sm:$0xf]  ;;  %v3871_v52 = vld [vmem:[#allocation5 + $0xac] sm:$0xf0] }
  0x25   :  { %251 = vmatpush.bf16.msrb.mxu0 %v2618_v37  ;;  %v3007_v53 = vld [vmem:[#allocation5 + $0x2c0] sm:$0xf]  ;;  %v3939_v54 = vld [vmem:[#allocation5 + $0x2cc] sm:$0xf0]  ;;  %v2736_v59 = vor.u32 %v3871_v52, %v2735_v51 }
  0x26   :  { %263 = vmatpush.bf16.msrb.mxu1 %v2622_v42  ;;  %v2863_v56 = vld [vmem:[#allocation5 + $0x1a0] sm:$0xf]  ;;  %v3903_v57 = vld [vmem:[#allocation5 + $0x1ac] sm:$0xf0]  ;;  %v3008_v60 = vor.u32 %v3939_v54, %v3007_v53 }
  0x27   :  { %239 = vmatpush.bf16.msrb.mxu3 %v2614_v36  ;;  %v3151_v58 = vld [vmem:[#allocation5 + $0x3e0] sm:$0xf]  ;;  %1436 = vmatpush.bf16.msra.mxu2 %v2752_v49  ;;  %v3975_v62 = vld [vmem:[#allocation5 + $0x3ec] sm:$0xf0]  ;;  %v2864_v3 = vor.u32 %v3903_v57, %v2863_v56 }
  0x28   :  { %v2719_v61 = vld [vmem:[#allocation5 + $0x80] sm:$0xf]  ;;  %v3867_v63 = vld [vmem:[#allocation5 + $0x8c] sm:$0xf0]  ;;  %v3152_v2 = vor.u32 %v3975_v62, %v3151_v58  ;;  %2651 = vmatmul.msk.f32.vlgmr.msrb.gmra.mxu0 %vm192_vm0, %v4386_v20 }
  0x29   :  { %1459 = vmatpush.bf16.msra.mxu0 %v3024_v50  ;;  %v2991_v0 = vld [vmem:[#allocation5 + $0x2a0] sm:$0xf]  ;;  %v3935_v1 = vld [vmem:[#allocation5 + $0x2ac] sm:$0xf0]  ;;  %2652 = vmatmul.msk.f32.vlgmr.msrb.gmra.mxu1 %vm192_vm0, %v4386_v20  ;;  %v2720_v8 = vor.u32 %v3867_v63, %v2719_v61 }
  0x2a   :  { %v3135_v4 = vld [vmem:[#allocation5 + $0x3c0] sm:$0xf]  ;;  %v3971_v5 = vld [vmem:[#allocation5 + $0x3cc] sm:$0xf0]  ;;  %2650 = vmatmul.msk.f32.vlgmr.msrb.gmra.mxu3 %vm192_vm0, %v4386_v20  ;;  %v2992_v9 = vor.u32 %v3935_v1, %v2991_v0  ;;  %1471 = vmatpush.bf16.msra.mxu1 %v3152_v2 }
  0x2b   :  { %1447 = vmatpush.bf16.msra.mxu3 %v2896_v43  ;;  %v2847_v6 = vld [vmem:[#allocation5 + $0x180] sm:$0xf]  ;;  %v3899_v7 = vld [vmem:[#allocation5 + $0x18c] sm:$0xf0]  ;;  %1437 = vmatpush.bf16.msra.mxu2 %v2736_v59  ;;  %v3136_v14 = vor.u32 %v3971_v5, %v3135_v4  ;;  %v3877_v5 = vld [vmem:[#allocation5 + $0xe4] sm:$0xf] }
  0x2c   :  { %v2703_v10 = vld [vmem:[#allocation5 + $0x60] sm:$0xf]  ;;  %v3863_v11 = vld [vmem:[#allocation5 + $0x6c] sm:$0xf0]  ;;  %v2848_v15 = vor.u32 %v3899_v7, %v2847_v6  ;;  %v2769_v6 = vld [vmem:[#allocation5 + $0xf0] sm:$0xf0] }
  0x2d   :  { %1460 = vmatpush.bf16.msra.mxu0 %v3008_v60  ;;  %v2975_v12 = vld [vmem:[#allocation5 + $0x280] sm:$0xf]  ;;  %v3931_v13 = vld [vmem:[#allocation5 + $0x28c] sm:$0xf0]  ;;  %v2704_v20 = vor.u32 %v3863_v11, %v2703_v10 }
  0x2e   :  { %v3119_v16 = vld [vmem:[#allocation5 + $0x3a0] sm:$0xf]  ;;  %v3967_v17 = vld [vmem:[#allocation5 + $0x3ac] sm:$0xf0]  ;;  %v2976_v21 = vor.u32 %v3931_v13, %v2975_v12  ;;  %1472 = vmatpush.bf16.msra.mxu1 %v3136_v14  ;;  %v2772_v14 = vor.u32 %v3877_v5, %v2769_v6 }
  0x2f   :  { %1448 = vmatpush.bf16.msra.mxu3 %v2880_v55  ;;  %v2831_v18 = vld [vmem:[#allocation5 + $0x160] sm:$0xf]  ;;  %v3895_v19 = vld [vmem:[#allocation5 + $0x16c] sm:$0xf0]  ;;  %1438 = vmatpush.bf16.msra.mxu2 %v2720_v8  ;;  %v3120_v26 = vor.u32 %v3967_v17, %v3119_v16 }
  0x30   :  { %v2687_v22 = vld [vmem:[#allocation5 + $0x40] sm:$0xf]  ;;  %v3859_v23 = vld [vmem:[#allocation5 + $0x4c] sm:$0xf0]  ;;  %v2832_v27 = vor.u32 %v3895_v19, %v2831_v18  ;;  %v3873_v18 = vld [vmem:[#allocation5 + $0xc4] sm:$0xf] }
  0x31   :  { %1461 = vmatpush.bf16.msra.mxu0 %v2992_v9  ;;  %v2959_v24 = vld [vmem:[#allocation5 + $0x260] sm:$0xf]  ;;  %v3927_v25 = vld [vmem:[#allocation5 + $0x26c] sm:$0xf0]  ;;  %v2688_v32 = vor.u32 %v3859_v23, %v2687_v22  ;;  %v2753_v19 = vld [vmem:[#allocation5 + $0xd0] sm:$0xf0] }
  0x32   :  { %v3103_v28 = vld [vmem:[#allocation5 + $0x380] sm:$0xf]  ;;  %v3963_v29 = vld [vmem:[#allocation5 + $0x38c] sm:$0xf0]  ;;  %v2960_v33 = vor.u32 %v3927_v25, %v2959_v24  ;;  %1473 = vmatpush.bf16.msra.mxu1 %v3120_v26  ;;  %v3909_v25 = vld [vmem:[#allocation5 + $0x1e4] sm:$0xf] }
  0x33   :  { %1449 = vmatpush.bf16.msra.mxu3 %v2864_v3  ;;  %v2815_v30 = vld [vmem:[#allocation5 + $0x140] sm:$0xf]  ;;  %v3891_v31 = vld [vmem:[#allocation5 + $0x14c] sm:$0xf0]  ;;  %1439 = vmatpush.bf16.msra.mxu2 %v2704_v20  ;;  %v3104_v38 = vor.u32 %v3963_v29, %v3103_v28  ;;  %v2897_v26 = vld [vmem:[#allocation5 + $0x1f0] sm:$0xf0]  ;;  %v2756_v28 = vor.u32 %v3873_v18, %v2753_v19 }
  0x34   :  { %v2671_v34 = vld [vmem:[#allocation5 + $0x20] sm:$0xf]  ;;  %v3855_v35 = vld [vmem:[#allocation5 + $0x2c] sm:$0xf0]  ;;  %v2816_v39 = vor.u32 %v3891_v31, %v2815_v30  ;;  %v3853_v19 = vld [vmem:[#allocation5 + $0x24] sm:$0xf] }
  0x35   :  { %1462 = vmatpush.bf16.msra.mxu0 %v2976_v21  ;;  %v2943_v36 = vld [vmem:[#allocation5 + $0x240] sm:$0xf]  ;;  %v3923_v37 = vld [vmem:[#allocation5 + $0x24c] sm:$0xf0]  ;;  %v2672_v44 = vor.u32 %v3855_v35, %v2671_v34 }
  0x36   :  { %v3087_v40 = vld [vmem:[#allocation5 + $0x360] sm:$0xf]  ;;  %v3959_v41 = vld [vmem:[#allocation5 + $0x36c] sm:$0xf0]  ;;  %v2944_v45 = vor.u32 %v3923_v37, %v2943_v36  ;;  %1474 = vmatpush.bf16.msra.mxu1 %v3104_v38  ;;  %v2900_v36 = vor.u32 %v3909_v25, %v2897_v26  ;;  %v3905_v38 = vld [vmem:[#allocation5 + $0x1c4] sm:$0xf] }
  0x37   :  { %1450 = vmatpush.bf16.msra.mxu3 %v2848_v15  ;;  %v2799_v42 = vld [vmem:[#allocation5 + $0x120] sm:$0xf]  ;;  %v3887_v43 = vld [vmem:[#allocation5 + $0x12c] sm:$0xf0]  ;;  %1440 = vmatpush.bf16.msra.mxu2 %v2688_v32  ;;  %v3088_v51 = vor.u32 %v3959_v41, %v3087_v40  ;;  %v3869_v32 = vld [vmem:[#allocation5 + $0xa4] sm:$0xf] }
  0x38   :  { %v2655_v46 = vld [vmem:[#allocation5] sm:$0xf]  ;;  %v3851_v47 = vld [vmem:[#allocation5 + $0xc] sm:$0xf0]  ;;  %v2800_v52 = vor.u32 %v3887_v43, %v2799_v42  ;;  %v3849_v25 = vld [vmem:[#allocation5 + $0x4] sm:$0xf] }
  0x39   :  { %1463 = vmatpush.bf16.msra.mxu0 %v2960_v33  ;;  %v3279_v48 = vld [vmem:[#allocation5 + $0x4e0] sm:$0xf]  ;;  %v3919_v50 = vld [vmem:[#allocation5 + $0x22c] sm:$0xf0]  ;;  %v2656_v58 = vor.u32 %v3851_v47, %v2655_v46  ;;  %v2737_v33 = vld [vmem:[#allocation5 + $0xb0] sm:$0xf0] }
  0x3a   :  { %v2927_v49 = vld [vmem:[#allocation5 + $0x220] sm:$0xf]  ;;  %v4007_v53 = vld [vmem:[#allocation5 + $0x4ec] sm:$0xf0]  ;;  %1475 = vmatpush.bf16.msra.mxu1 %v3088_v51  ;;  %v2740_v41 = vor.u32 %v3869_v32, %v2737_v33  ;;  %v2865_v51 = vld [vmem:[#allocation5 + $0x1b0] sm:$0xf0] }
  0x3b   :  { %1451 = vmatpush.bf16.msra.mxu3 %v2832_v27  ;;  %v3071_v54 = vld [vmem:[#allocation5 + $0x340] sm:$0xf]  ;;  %v3955_v55 = vld [vmem:[#allocation5 + $0x34c] sm:$0xf0]  ;;  %1441 = vmatpush.bf16.msra.mxu2 %v2672_v44  ;;  %v2928_v61 = vor.u32 %v3919_v50, %v2927_v49  ;;  %v3280_v62 = vor.u32 %v4007_v53, %v3279_v48  ;;  %v3865_v44 = vld [vmem:[#allocation5 + $0x84] sm:$0xf] }
  0x3c   :  { %v2783_v56 = vld [vmem:[#allocation5 + $0x100] sm:$0xf]  ;;  %v3883_v57 = vld [vmem:[#allocation5 + $0x10c] sm:$0xf0]  ;;  %v3072_v2 = vor.u32 %v3955_v55, %v3071_v54  ;;  %v3901_v50 = vld [vmem:[#allocation5 + $0x1a4] sm:$0xf] }
  0x3d   :  { %1464 = vmatpush.bf16.msra.mxu0 %v2944_v45  ;;  %v3407_v59 = vld [vmem:[#allocation5 + $0x5e0] sm:$0xf]  ;;  %v4039_v60 = vld [vmem:[#allocation5 + $0x5ec] sm:$0xf0]  ;;  %v2784_v3 = vor.u32 %v3883_v57, %v2783_v56  ;;  %v2721_v45 = vld [vmem:[#allocation5 + $0x90] sm:$0xf0] }
  0x3e   :  { %v3263_v63 = vld [vmem:[#allocation5 + $0x4c0] sm:$0xf]  ;;  %v3915_v1 = vld [vmem:[#allocation5 + $0x20c] sm:$0xf0]  ;;  %v3408_v7 = vor.u32 %v4039_v60, %v3407_v59  ;;  %1476 = vmatpush.bf16.msra.mxu1 %v3072_v2  ;;  %v2724_v53 = vor.u32 %v3865_v44, %v2721_v45  ;;  %v3861_v56 = vld [vmem:[#allocation5 + $0x64] sm:$0xf]  ;;  %v2868_v59 = vor.u32 %v3901_v50, %v2865_v51 }
  0x3f   :  { %1452 = vmatpush.bf16.msra.mxu3 %v2816_v39  ;;  %v2911_v0 = vld [vmem:[#allocation5 + $0x200] sm:$0xf]  ;;  %v4003_v4 = vld [vmem:[#allocation5 + $0x4cc] sm:$0xf0]  ;;  %1442 = vmatpush.bf16.msra.mxu2 %v2656_v58  ;;  %v2881_v39 = vld [vmem:[#allocation5 + $0x1d0] sm:$0xf0] }
  0x40   :  { %v3055_v8 = vld [vmem:[#allocation5 + $0x320] sm:$0xf]  ;;  %v3951_v9 = vld [vmem:[#allocation5 + $0x32c] sm:$0xf0]  ;;  %v2912_v12 = vor.u32 %v3915_v1, %v2911_v0  ;;  %v3264_v13 = vor.u32 %v4003_v4, %v3263_v63  ;;  %v2884_v48 = vor.u32 %v3905_v38, %v2881_v39  ;;  %v2705_v57 = vld [vmem:[#allocation5 + $0x70] sm:$0xf0] }
  0x41   :  { %1465 = vmatpush.bf16.msra.mxu0 %v2928_v61  ;;  %v3391_v10 = vld [vmem:[#allocation5 + $0x5c0] sm:$0xf]  ;;  %v4035_v11 = vld [vmem:[#allocation5 + $0x5cc] sm:$0xf0]  ;;  %v3056_v17 = vor.u32 %v3951_v9, %v3055_v8  ;;  %v2708_v63 = vor.u32 %v3861_v56, %v2705_v57  ;;  %v2689_v8 = vld [vmem:[#allocation5 + $0x50] sm:$0xf0] }
  0x42   :  { %v3247_v15 = vld [vmem:[#allocation5 + $0x4a0] sm:$0xf]  ;;  %v3999_v16 = vld [vmem:[#allocation5 + $0x4ac] sm:$0xf0]  ;;  %v3392_v20 = vor.u32 %v4035_v11, %v3391_v10  ;;  %v3897_v10 = vld [vmem:[#allocation5 + $0x184] sm:$0xf] }
  0x43   :  { %1453 = vmatpush.bf16.msra.mxu3 %v2800_v52  ;;  %1483 = vmatpush.bf16.msrb.mxu2 %v3280_v62  ;;  %v3375_v21 = vld [vmem:[#allocation5 + $0x5a0] sm:$0xf]  ;;  %v3947_v23 = vld [vmem:[#allocation5 + $0x30c] sm:$0xf0]  ;;  %v3248_v27 = vor.u32 %v3999_v16, %v3247_v15  ;;  %v2849_v11 = vld [vmem:[#allocation5 + $0x190] sm:$0xf0] }
  0x44   :  { %v3039_v22 = vld [vmem:[#allocation5 + $0x300] sm:$0xf]  ;;  %v4031_v24 = vld [vmem:[#allocation5 + $0x5ac] sm:$0xf0]  ;;  %1477 = vmatpush.bf16.msra.mxu1 %v3056_v17  ;;  %v2657_v26 = vld [vmem:[#allocation5 + $0x10] sm:$0xf0] }
  0x45   :  { %1466 = vmatpush.bf16.msra.mxu0 %v2912_v12  ;;  %v3231_v29 = vld [vmem:[#allocation5 + $0x480] sm:$0xf]  ;;  %v3995_v30 = vld [vmem:[#allocation5 + $0x48c] sm:$0xf0]  ;;  %v3040_v31 = vor.u32 %v3947_v23, %v3039_v22  ;;  %v3376_v34 = vor.u32 %v4031_v24, %v3375_v21  ;;  %v2852_v12 = vor.u32 %v3897_v10, %v2849_v11  ;;  %v3893_v21 = vld [vmem:[#allocation5 + $0x164] sm:$0xf] }
  0x46   :  { %v3359_v35 = vld [vmem:[#allocation5 + $0x580] sm:$0xf]  ;;  %v4027_v37 = vld [vmem:[#allocation5 + $0x58c] sm:$0xf0]  ;;  %v3232_v40 = vor.u32 %v3995_v30, %v3231_v29  ;;  %v2833_v23 = vld [vmem:[#allocation5 + $0x170] sm:$0xf0] }
  0x47   :  { %1454 = vmatpush.bf16.msra.mxu3 %v2784_v3  ;;  %1484 = vmatpush.bf16.msrb.mxu2 %v3264_v13  ;;  %v3215_v42 = vld [vmem:[#allocation5 + $0x460] sm:$0xf]  ;;  %v3991_v43 = vld [vmem:[#allocation5 + $0x46c] sm:$0xf0]  ;;  %v3360_v46 = vor.u32 %v4027_v37, %v3359_v35  ;;  %v2836_v24 = vor.u32 %v3893_v21, %v2833_v23  ;;  %v2817_v29 = vld [vmem:[#allocation5 + $0x150] sm:$0xf0] }
  0x48   :  { %1478 = vmatpush.bf16.msra.mxu1 %v3040_v31  ;;  %v3343_v47 = vld [vmem:[#allocation5 + $0x560] sm:$0xf]  ;;  %v4023_v49 = vld [vmem:[#allocation5 + $0x56c] sm:$0xf0]  ;;  %v3216_v52 = vor.u32 %v3991_v43, %v3215_v42  ;;  %v3885_v31 = vld [vmem:[#allocation5 + $0x124] sm:$0xf] }
  0x49   :  { %1507 = vmatpush.bf16.msrb.mxu0 %v2772_v14  ;;  %v3199_v54 = vld [vmem:[#allocation5 + $0x440] sm:$0xf]  ;;  %v3987_v55 = vld [vmem:[#allocation5 + $0x44c] sm:$0xf0]  ;;  %v3344_v58 = vor.u32 %v4023_v49, %v3343_v47  ;;  %v2801_v32 = vld [vmem:[#allocation5 + $0x130] sm:$0xf0] }
  0x4a   :  { %v3327_v60 = vld [vmem:[#allocation5 + $0x540] sm:$0xf]  ;;  %v4019_v61 = vld [vmem:[#allocation5 + $0x54c] sm:$0xf0]  ;;  %v3200_v62 = vor.u32 %v3987_v55, %v3199_v54  ;;  %v2804_v33 = vor.u32 %v3885_v31, %v2801_v32  ;;  %v2785_v35 = vld [vmem:[#allocation5 + $0x110] sm:$0xf0] }
  0x4b   :  { %1495 = vmatpush.bf16.msrb.mxu3 %v3408_v7  ;;  %1485 = vmatpush.bf16.msrb.mxu2 %v3248_v27  ;;  %v3328_v0 = vor.u32 %v4019_v61, %v3327_v60  ;;  %v3183_v1 = vld [vmem:[#allocation5 + $0x420] sm:$0xf]  ;;  %v3983_v2 = vld [vmem:[#allocation5 + $0x42c] sm:$0xf0]  ;;  %v3857_v7 = vld [vmem:[#allocation5 + $0x44] sm:$0xf]  ;;  %v2660_v27 = vor.u32 %v3849_v25, %v2657_v26 }
  0x4c   :  { %1519 = vmatpush.bf16.msrb.mxu1 %v2900_v36  ;;  %v3311_v3 = vld [vmem:[#allocation5 + $0x520] sm:$0xf]  ;;  %v3184_v4 = vor.u32 %v3983_v2, %v3183_v1  ;;  %v4015_v5 = vld [vmem:[#allocation5 + $0x52c] sm:$0xf0]  ;;  %v2692_v9 = vor.u32 %v3857_v7, %v2689_v8  ;;  %v3941_v42 = vld [vmem:[#allocation5 + $0x2e4] sm:$0xf] }
  0x4d   :  { %1508 = vmatpush.bf16.msrb.mxu0 %v2756_v28  ;;  %v3312_v6 = vor.u32 %v4015_v5, %v3311_v3  ;;  %v3167_v13 = vld [vmem:[#allocation5 + $0x400] sm:$0xf]  ;;  %v3979_v14 = vld [vmem:[#allocation5 + $0x40c] sm:$0xf0]  ;;  %v3889_v28 = vld [vmem:[#allocation5 + $0x144] sm:$0xf] }
  0x4e   :  { %v3295_v15 = vld [vmem:[#allocation5 + $0x500] sm:$0xf]  ;;  %v3168_v16 = vor.u32 %v3979_v14, %v3167_v13  ;;  %v4011_v17 = vld [vmem:[#allocation5 + $0x50c] sm:$0xf0]  ;;  %v2820_v30 = vor.u32 %v3889_v28, %v2817_v29  ;;  %v3025_v43 = vld [vmem:[#allocation5 + $0x2f0] sm:$0xf0] }
  0x4f   :  { %1496 = vmatpush.bf16.msrb.mxu3 %v3392_v20  ;;  %1486 = vmatpush.bf16.msrb.mxu2 %v3232_v40  ;;  %v3296_v18 = vor.u32 %v4011_v17, %v3295_v15  ;;  %v2673_v20 = vld [vmem:[#allocation5 + $0x30] sm:$0xf0]  ;;  %v95_v37 = vld [vmem:[%s4517_s6] ss:$8 sm:$0xf]  ;;  %v3028_v50 = vor.u32 %v3941_v42, %v3025_v43 }
  0x50   :  { %1520 = vmatpush.bf16.msrb.mxu1 %v2884_v48  ;;  %v2676_v22 = vor.u32 %v3853_v19, %v2673_v20  ;;  %v96_v38 = vld [vmem:[%s4517_s6] ss:$8 sm:$0x30]  ;;  %v3973_v45 = vld [vmem:[#allocation5 + $0x3e4] sm:$0xf] }
  0x51   :  { %1509 = vmatpush.bf16.msrb.mxu0 %v2740_v41  ;;  %v4406_v39 = vor.u32 %v96_v38, %v95_v37  ;;  %v3009_v54 = vld [vmem:[#allocation5 + $0x2d0] sm:$0xf0]  ;;  %v3969_v57 = vld [vmem:[#allocation5 + $0x3c4] sm:$0xf] }
  0x52   :  { %v4005_v61 = vld [vmem:[#allocation5 + $0x4e4] sm:$0xf]  ;;  %v2993_v3 = vld [vmem:[#allocation5 + $0x2b0] sm:$0xf0] }
  0x53   :  { %1497 = vmatpush.bf16.msrb.mxu3 %v3376_v34  ;;  %1487 = vmatpush.bf16.msrb.mxu2 %v3216_v52  ;;  %v3881_v34 = vld [vmem:[#allocation5 + $0x104] sm:$0xf]  ;;  %v120_v40 = vperm.slane %v4406_v39, 0  ;;  %v121_v41 = vperm.slane %v4406_v39, 1  ;;  %v122_v56 = vperm.slane %v4406_v39, 2  ;;  %v123_v21 = vperm.slane %v4406_v39, 3 }
  0x54   :  { %1521 = vmatpush.bf16.msrb.mxu1 %v2868_v59  ;;  %v2788_v36 = vor.u32 %v3881_v34, %v2785_v35  ;;  %v124_v59 = vperm.slane %v4406_v39, 4  ;;  %v3933_v2 = vld [vmem:[#allocation5 + $0x2a4] sm:$0xf]  ;;  %v3121_v7 = vld [vmem:[#allocation5 + $0x3b0] sm:$0xf0] }
  0x55   :  { %1510 = vmatpush.bf16.msrb.mxu0 %v2724_v53  ;;  %v3937_v53 = vld [vmem:[#allocation5 + $0x2c4] sm:$0xf]  ;;  %v2996_v13 = vor.u32 %v3933_v2, %v2993_v3  ;;  %v3265_v15 = vld [vmem:[#allocation5 + $0x4d0] sm:$0xf0] }
  0x56   :  { %v3012_v60 = vor.u32 %v3937_v53, %v3009_v54  ;;  %v4001_v14 = vld [vmem:[#allocation5 + $0x4c4] sm:$0xf]  ;;  %v2977_v19 = vld [vmem:[#allocation5 + $0x290] sm:$0xf0] }
  0x57   :  { %1498 = vmatpush.bf16.msrb.mxu3 %v3360_v46  ;;  %1488 = vmatpush.bf16.msrb.mxu2 %v3200_v62  ;;  %v3153_v46 = vld [vmem:[#allocation5 + $0x3f0] sm:$0xf0]  ;;  %v3997_v25 = vld [vmem:[#allocation5 + $0x4a4] sm:$0xf] }
  0x58   :  { %1522 = vmatpush.bf16.msrb.mxu1 %v2852_v12  ;;  %v3156_v52 = vor.u32 %v3973_v45, %v3153_v46  ;;  %v3281_v62 = vld [vmem:[#allocation5 + $0x4f0] sm:$0xf0]  ;;  %v4037_v28 = vld [vmem:[#allocation5 + $0x5e4] sm:$0xf] }
  0x59   :  { %1511 = vmatpush.bf16.msrb.mxu0 %v2708_v63  ;;  %v125_v63 = vperm.slane %v4406_v39, 5  ;;  %v3105_v23 = vld [vmem:[#allocation5 + $0x390] sm:$0xf0]  ;;  %v3925_v32 = vld [vmem:[#allocation5 + $0x264] sm:$0xf] }
  0x5a   :  { %v3409_v29 = vld [vmem:[#allocation5 + $0x5f0] sm:$0xf0]  ;;  %v3957_v35 = vld [vmem:[#allocation5 + $0x364] sm:$0xf] }
  0x5b   :  { %1499 = vmatpush.bf16.msrb.mxu3 %v3344_v58  ;;  %1489 = vmatpush.bf16.msrb.mxu2 %v3184_v4  ;;  %v3137_v58 = vld [vmem:[#allocation5 + $0x3d0] sm:$0xf0]  ;;  %v3412_v38 = vor.u32 %v4037_v28, %v3409_v29  ;;  %v3993_v39 = vld [vmem:[#allocation5 + $0x484] sm:$0xf]  ;;  %v2759_v29 = vld [vmem:[#allocation5 + $0xc8] sm:$0xf] }
  0x5c   :  { %1523 = vmatpush.bf16.msrb.mxu1 %v2836_v24  ;;  %v3140_v1 = vor.u32 %v3969_v57, %v3137_v58  ;;  %v3268_v24 = vor.u32 %v4001_v14, %v3265_v15  ;;  %v4033_v43 = vld [vmem:[#allocation5 + $0x5c4] sm:$0xf]  ;;  %v3377_v58 = vld [vmem:[#allocation5 + $0x5b0] sm:$0xf0]  ;;  %v3880_v14 = vld [vmem:[#allocation5 + $0xf4] sm:$0xf0] }
  0x5d   :  { %1512 = vmatpush.bf16.msrb.mxu0 %v2692_v9  ;;  %v3284_v9 = vor.u32 %v4005_v61, %v3281_v62  ;;  %v3921_v46 = vld [vmem:[#allocation5 + $0x244] sm:$0xf]  ;;  %v2929_v61 = vld [vmem:[#allocation5 + $0x230] sm:$0xf0] }
  0x5e   :  { %v3989_v53 = vld [vmem:[#allocation5 + $0x464] sm:$0xf] }
  0x5f   :  { %1500 = vmatpush.bf16.msrb.mxu3 %v3328_v0  ;;  %1490 = vmatpush.bf16.msrb.mxu2 %v3168_v16  ;;  %v4029_v57 = vld [vmem:[#allocation5 + $0x5a4] sm:$0xf] }
  0x60   :  { %1524 = vmatpush.bf16.msrb.mxu1 %v2820_v30  ;;  %v3949_v62 = vld [vmem:[#allocation5 + $0x324] sm:$0xf] }
  0x61   :  { %1513 = vmatpush.bf16.msrb.mxu0 %v2676_v22  ;;  %v3961_v22 = vld [vmem:[#allocation5 + $0x384] sm:$0xf] }
  0x62   :  { %v3108_v31 = vor.u32 %v3961_v22, %v3105_v23  ;;  %v3985_v2 = vld [vmem:[#allocation5 + $0x444] sm:$0xf]  ;;  %v3185_v23 = vld [vmem:[#allocation5 + $0x430] sm:$0xf0] }
  0x63   :  { %1501 = vmatpush.bf16.msrb.mxu3 %v3312_v6  ;;  %v3965_v6 = vld [vmem:[#allocation5 + $0x3a4] sm:$0xf] }
  0x64   :  { %1525 = vmatpush.bf16.msrb.mxu1 %v2804_v33  ;;  %v3124_v17 = vor.u32 %v3965_v6, %v3121_v7  ;;  %v2961_v33 = vld [vmem:[#allocation5 + $0x270] sm:$0xf0] }
  0x65   :  { %1514 = vmatpush.bf16.msrb.mxu0 %v2660_v27  ;;  %v3249_v27 = vld [vmem:[#allocation5 + $0x4b0] sm:$0xf0]  ;;  %v2964_v42 = vor.u32 %v3925_v32, %v2961_v33  ;;  %v2887_v33 = vld [vmem:[#allocation5 + $0x1c8] sm:$0xf] }
  0x66   :  { %v3252_v37 = vor.u32 %v3997_v25, %v3249_v27  ;;  %v3361_v6 = vld [vmem:[#allocation5 + $0x590] sm:$0xf0] }
  0x67   :  { %1502 = vmatpush.bf16.msrb.mxu3 %v3296_v18  ;;  %v3929_v18 = vld [vmem:[#allocation5 + $0x284] sm:$0xf]  ;;  %v3345_v25 = vld [vmem:[#allocation5 + $0x570] sm:$0xf0] }
  0x68   :  { %1526 = vmatpush.bf16.msrb.mxu1 %v2788_v36  ;;  %v2980_v26 = vor.u32 %v3929_v18, %v2977_v19  ;;  %v3089_v36 = vld [vmem:[#allocation5 + $0x370] sm:$0xf0]  ;;  %v2903_v18 = vld [vmem:[#allocation5 + $0x1e8] sm:$0xf]  ;;  %v3912_v19 = vld [vmem:[#allocation5 + $0x1f4] sm:$0xf0] }
  0x69   :  { %v3092_v45 = vor.u32 %v3957_v35, %v3089_v36  ;;  %v2904_v28 = vor.u32 %v3912_v19, %v2903_v18  ;;  %v3977_v35 = vld [vmem:[#allocation5 + $0x404] sm:$0xf]  ;;  %v3169_v36 = vld [vmem:[#allocation5 + $0x410] sm:$0xf0]  ;;  %v2983_v18 = vld [vmem:[#allocation5 + $0x288] sm:$0xf] }
  0x9d   :  { %v205_v44 = vpop.f32.mrf.mxu0 }
  0x9e   :  { %v206_v47 = vadd.f32 %v205_v44, %v120_v40  ;;  %v217_v48 = vpop.f32.mrf.mxu1  ;;  %v3233_v40 = vld [vmem:[#allocation5 + $0x490] sm:$0xf0] }
  0x9f   :  { %v218_v49 = vadd.f32 %v217_v48, %v121_v41  ;;  %v3393_v44 = vld [vmem:[#allocation5 + $0x5d0] sm:$0xf0]  ;;  %v3953_v48 = vld [vmem:[#allocation5 + $0x344] sm:$0xf] }
  0xa0   :  { %v4410_v51 = vmax.f32 %v206_v47, 0.0  ;;  %v2945_v47 = vld [vmem:[#allocation5 + $0x250] sm:$0xf0] }
  0xa1   :  { %v4412_v55 = vmax.f32 %v218_v49, 0.0  ;;  %v3073_v49 = vld [vmem:[#allocation5 + $0x350] sm:$0xf0]  ;;  %v2948_v54 = vor.u32 %v3921_v46, %v2945_v47  ;;  %v3172_v46 = vor.u32 %v3977_v35, %v3169_v36  ;;  %v3968_v35 = vld [vmem:[#allocation5 + $0x3b4] sm:$0xf0] }
  0xa2   :  { %1443 = vmatmul.f32.vlgmr.msra.gmra.mxu2 %v4410_v51 }
  0xa3   :  { %1455 = vmatmul.f32.vlgmr.msra.gmra.mxu3 %v4412_v55  ;;  %1531 = vmatpush.bf16.msra.mxu2 %v3028_v50  ;;  %v3236_v50 = vor.u32 %v3993_v39, %v3233_v40  ;;  %v3031_v40 = vld [vmem:[#allocation5 + $0x2e8] sm:$0xf] }
  0xa4   :  { %1543 = vmatpush.bf16.msra.mxu3 %v3156_v52  ;;  %v3396_v52 = vor.u32 %v4033_v43, %v3393_v44  ;;  %v2743_v44 = vld [vmem:[#allocation5 + $0xa8] sm:$0xf] }
  0xa5   :  { %v229_v0 = vpop.f32.mrf.mxu3  ;;  %v253_v5 = vpop.f32.mrf.mxu0 }
  0xa6   :  { %v230_v4 = vadd.f32 %v229_v0, %v122_v56  ;;  %v254_v8 = vadd.f32 %v253_v5, %v124_v59  ;;  %v265_v10 = vpop.f32.mrf.mxu1  ;;  %v3217_v56 = vld [vmem:[#allocation5 + $0x470] sm:$0xf0]  ;;  %v3076_v59 = vor.u32 %v3953_v48, %v3073_v49  ;;  %v4025_v5 = vld [vmem:[#allocation5 + $0x584] sm:$0xf]  ;;  %v2871_v48 = vld [vmem:[#allocation5 + $0x1a8] sm:$0xf] }
  0xa7   :  { %1532 = vmatpush.bf16.msra.mxu2 %v3012_v60  ;;  %v266_v12 = vadd.f32 %v265_v10, %v125_v63  ;;  %v3917_v60 = vld [vmem:[#allocation5 + $0x224] sm:$0xf]  ;;  %v3057_v63 = vld [vmem:[#allocation5 + $0x330] sm:$0xf0]  ;;  %v3220_v0 = vor.u32 %v3989_v53, %v3217_v56  ;;  %v3904_v49 = vld [vmem:[#allocation5 + $0x1b4] sm:$0xf0] }
  0xa8   :  { %v4419_v11 = vmax.f32 %v230_v4, 0.0  ;;  %1544 = vmatpush.bf16.msra.mxu3 %v3140_v1  ;;  %v4421_v16 = vmax.f32 %v254_v8, 0.0  ;;  %v3380_v1 = vor.u32 %v4029_v57, %v3377_v58  ;;  %v2932_v3 = vor.u32 %v3917_v60, %v2929_v61  ;;  %v3201_v4 = vld [vmem:[#allocation5 + $0x450] sm:$0xf0]  ;;  %v3913_v8 = vld [vmem:[#allocation5 + $0x204] sm:$0xf] }
  0xa9   :  { %v4424_v20 = vmax.f32 %v266_v12, 0.0  ;;  %v3060_v7 = vor.u32 %v3949_v62, %v3057_v63  ;;  %v3945_v10 = vld [vmem:[#allocation5 + $0x304] sm:$0xf]  ;;  %v3041_v12 = vld [vmem:[#allocation5 + $0x310] sm:$0xf0]  ;;  %v3204_v15 = vor.u32 %v3985_v2, %v3201_v4  ;;  %v2872_v58 = vor.u32 %v3904_v49, %v2871_v48 }
  0xaa   :  { %1467 = vmatmul.f32.vlgmr.msra.gmra.mxu0 %v4419_v11  ;;  %1491 = vmatmul.f32.vlgmr.msrb.gmra.mxu2 %v4421_v16  ;;  %v3313_v53 = vld [vmem:[#allocation5 + $0x530] sm:$0xf0]  ;;  %v3015_v56 = vld [vmem:[#allocation5 + $0x2c8] sm:$0xf]  ;;  %v3940_v57 = vld [vmem:[#allocation5 + $0x2d4] sm:$0xf0] }
  0xab   :  { %1555 = vmatpush.bf16.msra.mxu0 %v3284_v9  ;;  %1533 = vmatpush.bf16.msra.mxu2 %v2996_v13  ;;  %v2913_v9 = vld [vmem:[#allocation5 + $0x210] sm:$0xf0]  ;;  %v2775_v13 = vld [vmem:[#allocation5 + $0xe8] sm:$0xf]  ;;  %v3868_v60 = vld [vmem:[#allocation5 + $0x94] sm:$0xf0] }
  0xac   :  { %1503 = vmatmul.f32.vlgmr.msrb.gmra.mxu3 %v4424_v20  ;;  %v2916_v22 = vor.u32 %v3913_v8, %v2913_v9  ;;  %v2776_v27 = vor.u32 %v3880_v14, %v2775_v13  ;;  %v2855_v62 = vld [vmem:[#allocation5 + $0x188] sm:$0xf]  ;;  %v3900_v63 = vld [vmem:[#allocation5 + $0x194] sm:$0xf0]  ;;  %v3297_v2 = vld [vmem:[#allocation5 + $0x510] sm:$0xf0] }
  0xad   :  { %1545 = vmatpush.bf16.msra.mxu3 %v3124_v17  ;;  %v241_v30 = vpop.f32.mrf.mxu3  ;;  %v3364_v17 = vor.u32 %v4025_v5, %v3361_v6  ;;  %v3936_v5 = vld [vmem:[#allocation5 + $0x2b4] sm:$0xf0]  ;;  %v3159_v6 = vld [vmem:[#allocation5 + $0x3e8] sm:$0xf]  ;;  %v2856_v8 = vor.u32 %v3900_v63, %v2855_v62 }
  0xae   :  { %v242_v34 = vadd.f32 %v241_v30, %v123_v21  ;;  %v3981_v21 = vld [vmem:[#allocation5 + $0x424] sm:$0xf]  ;;  %v3876_v30 = vld [vmem:[#allocation5 + $0xd4] sm:$0xf0]  ;;  %v2711_v9 = vld [vmem:[#allocation5 + $0x68] sm:$0xf] }
  0xaf   :  { %1556 = vmatpush.bf16.msra.mxu0 %v3268_v24  ;;  %1534 = vmatpush.bf16.msra.mxu2 %v2980_v26  ;;  %v4021_v24 = vld [vmem:[#allocation5 + $0x564] sm:$0xf]  ;;  %v3044_v26 = vor.u32 %v3945_v10, %v3041_v12  ;;  %v2760_v39 = vor.u32 %v3876_v30, %v2759_v29  ;;  %v3864_v10 = vld [vmem:[#allocation5 + $0x74] sm:$0xf0]  ;;  %v2839_v13 = vld [vmem:[#allocation5 + $0x168] sm:$0xf] }
  0xb0   :  { %v4429_v41 = vmax.f32 %v242_v34, 0.0  ;;  %v3348_v32 = vor.u32 %v4021_v24, %v3345_v25  ;;  %v3908_v34 = vld [vmem:[#allocation5 + $0x1d4] sm:$0xf0]  ;;  %v2712_v19 = vor.u32 %v3864_v10, %v2711_v9  ;;  %v2695_v25 = vld [vmem:[#allocation5 + $0x48] sm:$0xf] }
  0xb1   :  { %1546 = vmatpush.bf16.msra.mxu3 %v3108_v31  ;;  %v3188_v31 = vor.u32 %v3981_v21, %v3185_v23  ;;  %v2888_v43 = vor.u32 %v3908_v34, %v2887_v33  ;;  %v3896_v14 = vld [vmem:[#allocation5 + $0x174] sm:$0xf0]  ;;  %v3127_v34 = vld [vmem:[#allocation5 + $0x3a8] sm:$0xf] }
  0xb2   :  { %1479 = vmatmul.f32.vlgmr.msra.gmra.mxu1 %v4429_v41  ;;  %1515 = vmatmul.f32.vlgmr.msrb.gmra.mxu0 %v4410_v51  ;;  %v3932_v21 = vld [vmem:[#allocation5 + $0x294] sm:$0xf0]  ;;  %v2840_v24 = vor.u32 %v3896_v14, %v2839_v13  ;;  %v2935_v62 = vld [vmem:[#allocation5 + $0x228] sm:$0xf] }
  0xb3   :  { %1557 = vmatpush.bf16.msra.mxu0 %v3252_v37  ;;  %1567 = vmatpush.bf16.msra.mxu1 %v3412_v38  ;;  %v4017_v37 = vld [vmem:[#allocation5 + $0x544] sm:$0xf]  ;;  %v3329_v38 = vld [vmem:[#allocation5 + $0x550] sm:$0xf0]  ;;  %v3972_v23 = vld [vmem:[#allocation5 + $0x3d4] sm:$0xf0]  ;;  %v2984_v29 = vor.u32 %v3932_v21, %v2983_v18 }
  0xb4   :  { %1535 = vmatpush.bf16.msra.mxu2 %v2964_v42  ;;  %v3944_v42 = vld [vmem:[#allocation5 + $0x2f4] sm:$0xf0]  ;;  %v3332_v47 = vor.u32 %v4017_v37, %v3329_v38  ;;  %v2679_v37 = vld [vmem:[#allocation5 + $0x28] sm:$0xf]  ;;  %v2777_v21 = vld [vmem:[#allocation5 + $0xf8] sm:$0xf0] }
  0xb5   :  { %1547 = vmatpush.bf16.msra.mxu3 %v3092_v45  ;;  %v3872_v45 = vld [vmem:[#allocation5 + $0xb4] sm:$0xf0]  ;;  %v3399_v10 = vld [vmem:[#allocation5 + $0x5c8] sm:$0xf] }
  0xb6   :  { %v3928_v33 = vld [vmem:[#allocation5 + $0x274] sm:$0xf0]  ;;  %v2919_v13 = vld [vmem:[#allocation5 + $0x208] sm:$0xf] }
  0xb7   :  { %1558 = vmatpush.bf16.msra.mxu0 %v3236_v50  ;;  %1568 = vmatpush.bf16.msra.mxu1 %v3396_v52  ;;  %v3032_v50 = vor.u32 %v3944_v42, %v3031_v40  ;;  %v4013_v52 = vld [vmem:[#allocation5 + $0x524] sm:$0xf]  ;;  %v3856_v38 = vld [vmem:[#allocation5 + $0x34] sm:$0xf0] }
  0xb8   :  { %1536 = vmatpush.bf16.msra.mxu2 %v2948_v54  ;;  %v2744_v54 = vor.u32 %v3872_v45, %v2743_v44  ;;  %v3316_v61 = vor.u32 %v4013_v52, %v3313_v53  ;;  %v3888_v40 = vld [vmem:[#allocation5 + $0x134] sm:$0xf0]  ;;  %v2951_v44 = vld [vmem:[#allocation5 + $0x248] sm:$0xf]  ;;  %v2680_v45 = vor.u32 %v3856_v38, %v2679_v37 }
  0xb9   :  { %1548 = vmatpush.bf16.msra.mxu3 %v3076_v59  ;;  %v2727_v59 = vld [vmem:[#allocation5 + $0x88] sm:$0xf]  ;;  %v3964_v48 = vld [vmem:[#allocation5 + $0x394] sm:$0xf0] }
  0xba   :  { %1527 = vmatmul.f32.vlgmr.msrb.gmra.mxu1 %v4412_v55  ;;  %v2728_v4 = vor.u32 %v3868_v60, %v2727_v59  ;;  %v3852_v52 = vld [vmem:[#allocation5 + $0x14] sm:$0xf0]  ;;  %v2791_v53 = vld [vmem:[#allocation5 + $0x108] sm:$0xf] }
  0xbb   :  { %1559 = vmatpush.bf16.msra.mxu0 %v3220_v0  ;;  %1569 = vmatpush.bf16.msra.mxu1 %v3380_v1  ;;  %v3016_v0 = vor.u32 %v3940_v57, %v3015_v56  ;;  %v4009_v1 = vld [vmem:[#allocation5 + $0x504] sm:$0xf]  ;;  %v3287_v56 = vld [vmem:[#allocation5 + $0x4e8] sm:$0xf]  ;;  %v4008_v57 = vld [vmem:[#allocation5 + $0x4f4] sm:$0xf0] }
  0xbc   :  { %1537 = vmatpush.bf16.msra.mxu2 %v2932_v3  ;;  %v2999_v3 = vld [vmem:[#allocation5 + $0x2a8] sm:$0xf]  ;;  %v3300_v12 = vor.u32 %v4009_v1, %v3297_v2  ;;  %v3960_v2 = vld [vmem:[#allocation5 + $0x374] sm:$0xf0] }
  0xbd   :  { %1549 = vmatpush.bf16.msra.mxu3 %v3060_v7  ;;  %v3976_v7 = vld [vmem:[#allocation5 + $0x3f4] sm:$0xf0]  ;;  %v3415_v60 = vld [vmem:[#allocation5 + $0x5e8] sm:$0xf] }
  0xbe   :  { %v3095_v1 = vld [vmem:[#allocation5 + $0x368] sm:$0xf]  ;;  %v3916_v14 = vld [vmem:[#allocation5 + $0x214] sm:$0xf0] }
  0xbf   :  { %1560 = vmatpush.bf16.msra.mxu0 %v3204_v15  ;;  %1570 = vmatpush.bf16.msra.mxu1 %v3364_v17  ;;  %v3000_v15 = vor.u32 %v3936_v5, %v2999_v3  ;;  %v3160_v17 = vor.u32 %v3976_v7, %v3159_v6  ;;  %v3271_v6 = vld [vmem:[#allocation5 + $0x4c8] sm:$0xf]  ;;  %v4004_v7 = vld [vmem:[#allocation5 + $0x4d4] sm:$0xf0]  ;;  %v3096_v9 = vor.u32 %v3960_v2, %v3095_v1 }
  0xc0   :  { %1538 = vmatpush.bf16.msra.mxu2 %v2916_v22  ;;  %v3143_v22 = vld [vmem:[#allocation5 + $0x3c8] sm:$0xf]  ;;  %v3272_v18 = vor.u32 %v4004_v7, %v3271_v6  ;;  %v3996_v37 = vld [vmem:[#allocation5 + $0x494] sm:$0xf0] }
  0xc1   :  { %1550 = vmatpush.bf16.msra.mxu3 %v3044_v26  ;;  %v3860_v26 = vld [vmem:[#allocation5 + $0x54] sm:$0xf0]  ;;  %v3144_v30 = vor.u32 %v3972_v23, %v3143_v22  ;;  %v3255_v23 = vld [vmem:[#allocation5 + $0x4a8] sm:$0xf] }
  0xc2   :  { %v3207_v2 = vld [vmem:[#allocation5 + $0x448] sm:$0xf] }
  0xc3   :  { %1561 = vmatpush.bf16.msra.mxu0 %v3188_v31  ;;  %1571 = vmatpush.bf16.msra.mxu1 %v3348_v32  ;;  %v2967_v31 = vld [vmem:[#allocation5 + $0x268] sm:$0xf]  ;;  %v2696_v32 = vor.u32 %v3860_v26, %v2695_v25  ;;  %v2920_v25 = vor.u32 %v3916_v14, %v2919_v13  ;;  %v2873_v13 = vld [vmem:[#allocation5 + $0x1b8] sm:$0xf0] }
  0xc4   :  { %1579 = vmatpush.bf16.msrb.mxu2 %v2776_v27  ;;  %1551 = vmatmul.f32.vlgmr.msra.gmra.mxu3 %v4429_v41  ;;  %v2823_v27 = vld [vmem:[#allocation5 + $0x148] sm:$0xf]  ;;  %v2968_v42 = vor.u32 %v3928_v33, %v2967_v31  ;;  %v3952_v31 = vld [vmem:[#allocation5 + $0x334] sm:$0xf0]  ;;  %v3874_v33 = vld [vmem:[#allocation5 + $0xcc] sm:$0xf] }
  0xc5   :  { %1591 = vmatpush.bf16.msrb.mxu3 %v2904_v28  ;;  %1539 = vmatmul.f32.vlgmr.msra.gmra.mxu2 %v4419_v11  ;;  %v3892_v28 = vld [vmem:[#allocation5 + $0x154] sm:$0xf0] }
  0xc6   :  { %v2824_v36 = vor.u32 %v3892_v28, %v2823_v27  ;;  %v3383_v27 = vld [vmem:[#allocation5 + $0x5a8] sm:$0xf]  ;;  %v4032_v28 = vld [vmem:[#allocation5 + $0x5b4] sm:$0xf0] }
  0xc7   :  { %1562 = vmatpush.bf16.msra.mxu0 %v3172_v46  ;;  %1572 = vmatpush.bf16.msra.mxu1 %v3332_v47  ;;  %v3924_v46 = vld [vmem:[#allocation5 + $0x254] sm:$0xf0]  ;;  %v3111_v47 = vld [vmem:[#allocation5 + $0x388] sm:$0xf] }
  0xc8   :  { %1580 = vmatpush.bf16.msrb.mxu2 %v2760_v39  ;;  %v2807_v39 = vld [vmem:[#allocation5 + $0x128] sm:$0xf]  ;;  %v3112_v59 = vor.u32 %v3964_v48, %v3111_v47  ;;  %v2745_v47 = vld [vmem:[#allocation5 + $0xb8] sm:$0xf0]  ;;  %v3910_v48 = vld [vmem:[#allocation5 + $0x1ec] sm:$0xf] }
  0xc9   :  { %1592 = vmatpush.bf16.msrb.mxu3 %v2888_v43  ;;  %v3128_v43 = vor.u32 %v3968_v35, %v3127_v34  ;;  %v2808_v49 = vor.u32 %v3888_v40, %v2807_v39  ;;  %v2761_v34 = vld [vmem:[#allocation5 + $0xd8] sm:$0xf0]  ;;  %v3384_v35 = vor.u32 %v4032_v28, %v3383_v27  ;;  %v3367_v39 = vld [vmem:[#allocation5 + $0x588] sm:$0xf]  ;;  %v4028_v40 = vld [vmem:[#allocation5 + $0x594] sm:$0xf0] }
  0xca   :  { %1563 = vmatmul.f32.vlgmr.msra.gmra.mxu0 %v4421_v16  ;;  %v2857_v27 = vld [vmem:[#allocation5 + $0x198] sm:$0xf0] }
  0xcb   :  { %1603 = vmatpush.bf16.msrb.mxu0 %v3032_v50  ;;  %1573 = vmatpush.bf16.msra.mxu1 %v3316_v61  ;;  %v2663_v50 = vld [vmem:[#allocation5 + $0x8] sm:$0xf]  ;;  %v4040_v61 = vld [vmem:[#allocation5 + $0x5f4] sm:$0xf0] }
  0xcc   :  { %1581 = vmatpush.bf16.msrb.mxu2 %v2744_v54  ;;  %v3884_v54 = vld [vmem:[#allocation5 + $0x114] sm:$0xf0]  ;;  %v2664_v63 = vor.u32 %v3852_v52, %v2663_v50  ;;  %v3416_v5 = vor.u32 %v4040_v61, %v3415_v60  ;;  %v3368_v50 = vor.u32 %v4028_v40, %v3367_v39  ;;  %v3223_v52 = vld [vmem:[#allocation5 + $0x468] sm:$0xf]  ;;  %v3866_v60 = vld [vmem:[#allocation5 + $0x8c] sm:$0xf] }
  0xcd   :  { %1593 = vmatpush.bf16.msrb.mxu3 %v2872_v58  ;;  %v2952_v58 = vor.u32 %v3924_v46, %v2951_v44  ;;  %v2792_v3 = vor.u32 %v3884_v54, %v2791_v53  ;;  %v3948_v44 = vld [vmem:[#allocation5 + $0x314] sm:$0xf0]  ;;  %v3854_v39 = vld [vmem:[#allocation5 + $0x2c] sm:$0xf] }
  0xce   :  { %v3992_v53 = vld [vmem:[#allocation5 + $0x474] sm:$0xf0] }
  0xcf   :  { %1604 = vmatpush.bf16.msrb.mxu0 %v3016_v0  ;;  %1574 = vmatpush.bf16.msra.mxu1 %v3300_v12  ;;  %v3920_v0 = vld [vmem:[#allocation5 + $0x234] sm:$0xf0]  ;;  %v3224_v61 = vor.u32 %v3992_v53, %v3223_v52  ;;  %v3970_v53 = vld [vmem:[#allocation5 + $0x3cc] sm:$0xf] }
  0xd0   :  { %1582 = vmatpush.bf16.msrb.mxu2 %v2728_v4  ;;  %v3288_v4 = vor.u32 %v4008_v57, %v3287_v56  ;;  %v4036_v12 = vld [vmem:[#allocation5 + $0x5d4] sm:$0xf0]  ;;  %v3351_v56 = vld [vmem:[#allocation5 + $0x568] sm:$0xf] }
  0xd1   :  { %1594 = vmatpush.bf16.msrb.mxu3 %v2856_v8  ;;  %v2936_v8 = vor.u32 %v3920_v0, %v2935_v62  ;;  %v3400_v22 = vor.u32 %v4036_v12, %v3399_v10  ;;  %v4024_v57 = vld [vmem:[#allocation5 + $0x574] sm:$0xf0]  ;;  %v2729_v62 = vld [vmem:[#allocation5 + $0x98] sm:$0xf0]  ;;  %v3902_v12 = vld [vmem:[#allocation5 + $0x1ac] sm:$0xf] }
  0xd2   :  { %1575 = vmatmul.f32.vlgmr.msra.gmra.mxu1 %v4424_v20  ;;  %v2889_v0 = vld [vmem:[#allocation5 + $0x1d8] sm:$0xf0]  ;;  %v3352_v1 = vor.u32 %v4024_v57, %v3351_v56  ;;  %v2732_v6 = vor.u32 %v3866_v60, %v2729_v62  ;;  %v3850_v56 = vld [vmem:[#allocation5 + $0xc] sm:$0xf] }
  0xd3   :  { %1605 = vmatpush.bf16.msrb.mxu0 %v3000_v15  ;;  %1615 = vmatpush.bf16.msrb.mxu1 %v3160_v17  ;;  %v3079_v15 = vld [vmem:[#allocation5 + $0x348] sm:$0xf]  ;;  %v3956_v17 = vld [vmem:[#allocation5 + $0x354] sm:$0xf0]  ;;  %v2713_v10 = vld [vmem:[#allocation5 + $0x78] sm:$0xf0] }
  0xd4   :  { %1583 = vmatpush.bf16.msrb.mxu2 %v2712_v19  ;;  %v3878_v19 = vld [vmem:[#allocation5 + $0xec] sm:$0xf]  ;;  %v3080_v26 = vor.u32 %v3956_v17, %v3079_v15  ;;  %v3191_v15 = vld [vmem:[#allocation5 + $0x428] sm:$0xf]  ;;  %v3984_v17 = vld [vmem:[#allocation5 + $0x434] sm:$0xf0] }
  0xd5   :  { %1595 = vmatpush.bf16.msrb.mxu3 %v2840_v24  ;;  %v4000_v24 = vld [vmem:[#allocation5 + $0x4b4] sm:$0xf0]  ;;  %v2665_v57 = vld [vmem:[#allocation5 + $0x18] sm:$0xf0] }
  0xd6   :  { %v3289_v62 = vld [vmem:[#allocation5 + $0x4f8] sm:$0xf0] }
  0xd7   :  { %1606 = vmatpush.bf16.msrb.mxu0 %v2984_v29  ;;  %1616 = vmatpush.bf16.msrb.mxu1 %v3144_v30  ;;  %v2780_v29 = vor.u32 %v3878_v19, %v2777_v21  ;;  %v3063_v30 = vld [vmem:[#allocation5 + $0x328] sm:$0xf]  ;;  %v4016_v19 = vld [vmem:[#allocation5 + $0x534] sm:$0xf0] }
  0xd8   :  { %1584 = vmatpush.bf16.msrb.mxu2 %v2696_v32  ;;  %v3256_v32 = vor.u32 %v4000_v24, %v3255_v23  ;;  %v3064_v38 = vor.u32 %v3952_v31, %v3063_v30  ;;  %v3858_v23 = vld [vmem:[#allocation5 + $0x4c] sm:$0xf]  ;;  %v3192_v24 = vor.u32 %v3984_v17, %v3191_v15  ;;  %v3980_v30 = vld [vmem:[#allocation5 + $0x414] sm:$0xf0]  ;;  %v3303_v31 = vld [vmem:[#allocation5 + $0x508] sm:$0xf] }
  0xd9   :  { %1596 = vmatpush.bf16.msrb.mxu3 %v2824_v36  ;;  %v3239_v36 = vld [vmem:[#allocation5 + $0x488] sm:$0xf]  ;;  %v2985_v15 = vld [vmem:[#allocation5 + $0x298] sm:$0xf0] }
  0xda   :  { %v3240_v46 = vor.u32 %v3996_v37, %v3239_v36  ;;  %v3974_v37 = vld [vmem:[#allocation5 + $0x3ec] sm:$0xf] }
  0xdb   :  { %1607 = vmatpush.bf16.msrb.mxu0 %v2968_v42  ;;  %1617 = vmatpush.bf16.msrb.mxu1 %v3128_v43  ;;  %v2764_v42 = vor.u32 %v3874_v33, %v2761_v34  ;;  %v3047_v43 = vld [vmem:[#allocation5 + $0x308] sm:$0xf]  ;;  %v3942_v33 = vld [vmem:[#allocation5 + $0x2ec] sm:$0xf]  ;;  %v3033_v34 = vld [vmem:[#allocation5 + $0x2f8] sm:$0xf0] }
  0xdc   :  { %1585 = vmatpush.bf16.msrb.mxu2 %v2680_v45  ;;  %v3870_v45 = vld [vmem:[#allocation5 + $0xac] sm:$0xf]  ;;  %v3048_v54 = vor.u32 %v3948_v44, %v3047_v43  ;;  %v2841_v44 = vld [vmem:[#allocation5 + $0x178] sm:$0xf0] }
  0xdd   :  { %1597 = vmatpush.bf16.msrb.mxu3 %v2808_v49  ;;  %v2905_v49 = vld [vmem:[#allocation5 + $0x1f8] sm:$0xf0]  ;;  %v3894_v43 = vld [vmem:[#allocation5 + $0x16c] sm:$0xf] }
  0xde   :  { %v2844_v52 = vor.u32 %v3894_v43, %v2841_v44  ;;  %v2953_v44 = vld [vmem:[#allocation5 + $0x258] sm:$0xf0] }
  0xdf   :  { %1608 = vmatpush.bf16.msrb.mxu0 %v2952_v58  ;;  %1618 = vmatpush.bf16.msrb.mxu1 %v3112_v59  ;;  %v2748_v58 = vor.u32 %v3870_v45, %v2745_v47  ;;  %v2908_v59 = vor.u32 %v3910_v48, %v2905_v49  ;;  %v3938_v48 = vld [vmem:[#allocation5 + $0x2cc] sm:$0xf]  ;;  %v3017_v49 = vld [vmem:[#allocation5 + $0x2d8] sm:$0xf0] }
  0xe0   :  { %1586 = vmatpush.bf16.msrb.mxu2 %v2664_v63  ;;  %v3906_v63 = vld [vmem:[#allocation5 + $0x1cc] sm:$0xf]  ;;  %v3020_v60 = vor.u32 %v3938_v48, %v3017_v49 }
  0xe1   :  { %1598 = vmatpush.bf16.msrb.mxu3 %v2792_v3  ;;  %v3988_v3 = vld [vmem:[#allocation5 + $0x454] sm:$0xf0]  ;;  %v2892_v7 = vor.u32 %v3906_v63, %v2889_v0  ;;  %v3934_v0 = vld [vmem:[#allocation5 + $0x2ac] sm:$0xf] }
  0xe2   :  { %v3990_v49 = vld [vmem:[#allocation5 + $0x46c] sm:$0xf] }
  0xe3   :  { %1609 = vmatpush.bf16.msrb.mxu0 %v2936_v8  ;;  %1619 = vmatpush.bf16.msrb.mxu1 %v3096_v9  ;;  %v3862_v8 = vld [vmem:[#allocation5 + $0x6c] sm:$0xf]  ;;  %v3208_v9 = vor.u32 %v3988_v3, %v3207_v2  ;;  %v2668_v2 = vor.u32 %v3850_v56, %v2665_v57 }
  0xe4   :  { %1627 = vmatpush.bf16.msra.mxu2 %v3288_v4  ;;  %1599 = vmatmul.f32.vlgmr.msrb.gmra.mxu3 %v4412_v55  ;;  %v3335_v4 = vld [vmem:[#allocation5 + $0x548] sm:$0xf]  ;;  %v2716_v21 = vor.u32 %v3862_v8, %v2713_v10  ;;  %v2809_v8 = vld [vmem:[#allocation5 + $0x138] sm:$0xf0]  ;;  %v4002_v10 = vld [vmem:[#allocation5 + $0x4cc] sm:$0xf] }
  0xe5   :  { %1639 = vmatpush.bf16.msra.mxu3 %v3416_v5  ;;  %1587 = vmatmul.f32.vlgmr.msrb.gmra.mxu2 %v4410_v51  ;;  %v4020_v5 = vld [vmem:[#allocation5 + $0x554] sm:$0xf0]  ;;  %v3918_v57 = vld [vmem:[#allocation5 + $0x22c] sm:$0xf] }
  0xe6   :  { %v3336_v14 = vor.u32 %v4020_v5, %v3335_v4  ;;  %v3966_v4 = vld [vmem:[#allocation5 + $0x3ac] sm:$0xf]  ;;  %v3129_v5 = vld [vmem:[#allocation5 + $0x3b8] sm:$0xf0] }
  0xe7   :  { %1610 = vmatpush.bf16.msrb.mxu0 %v2920_v25  ;;  %1620 = vmatpush.bf16.msrb.mxu1 %v3080_v26  ;;  %v2697_v25 = vld [vmem:[#allocation5 + $0x58] sm:$0xf0]  ;;  %v3898_v26 = vld [vmem:[#allocation5 + $0x18c] sm:$0xf] }
  0xe8   :  { %1628 = vmatpush.bf16.msra.mxu2 %v3272_v18  ;;  %v3319_v18 = vld [vmem:[#allocation5 + $0x528] sm:$0xf]  ;;  %v2860_v36 = vor.u32 %v3898_v26, %v2857_v27  ;;  %v3257_v26 = vld [vmem:[#allocation5 + $0x4b8] sm:$0xf0]  ;;  %v4038_v27 = vld [vmem:[#allocation5 + $0x5ec] sm:$0xf] }
  0xe9   :  { %1640 = vmatpush.bf16.msra.mxu3 %v3400_v22  ;;  %v2876_v22 = vor.u32 %v3902_v12, %v2873_v13  ;;  %v3320_v28 = vor.u32 %v4016_v19, %v3319_v18  ;;  %v3273_v12 = vld [vmem:[#allocation5 + $0x4d8] sm:$0xf0]  ;;  %v3132_v13 = vor.u32 %v3966_v4, %v3129_v5  ;;  %v3962_v18 = vld [vmem:[#allocation5 + $0x38c] sm:$0xf] }
  0xea   :  { %1611 = vmatmul.f32.vlgmr.msrb.gmra.mxu0 %v4419_v11  ;;  %v3113_v19 = vld [vmem:[#allocation5 + $0x398] sm:$0xf0]  ;;  %v3914_v5 = vld [vmem:[#allocation5 + $0x20c] sm:$0xf] }
  0xeb   :  { %1651 = vmatpush.bf16.msra.mxu0 %v2780_v29  ;;  %1621 = vmatpush.bf16.msrb.mxu1 %v3064_v38  ;;  %v3175_v29 = vld [vmem:[#allocation5 + $0x408] sm:$0xf]  ;;  %v3161_v38 = vld [vmem:[#allocation5 + $0x3f8] sm:$0xf0] }
  0xec   :  { %1629 = vmatpush.bf16.msra.mxu2 %v3256_v32  ;;  %v4012_v32 = vld [vmem:[#allocation5 + $0x514] sm:$0xf0]  ;;  %v3176_v40 = vor.u32 %v3980_v30, %v3175_v29  ;;  %v3164_v47 = vor.u32 %v3974_v37, %v3161_v38  ;;  %v3116_v29 = vor.u32 %v3962_v18, %v3113_v19  ;;  %v3926_v30 = vld [vmem:[#allocation5 + $0x26c] sm:$0xf]  ;;  %v3193_v18 = vld [vmem:[#allocation5 + $0x438] sm:$0xf0] }
  0xed   :  { %1641 = vmatpush.bf16.msra.mxu3 %v3384_v35  ;;  %v2700_v35 = vor.u32 %v3858_v23, %v2697_v25  ;;  %v3304_v45 = vor.u32 %v4012_v32, %v3303_v31  ;;  %v2793_v23 = vld [vmem:[#allocation5 + $0x118] sm:$0xf0]  ;;  %v3994_v37 = vld [vmem:[#allocation5 + $0x48c] sm:$0xf] }
  0xee   :  { %v2969_v31 = vld [vmem:[#allocation5 + $0x278] sm:$0xf0]  ;;  %v4022_v19 = vld [vmem:[#allocation5 + $0x56c] sm:$0xf] }
  0xef   :  { %1652 = vmatpush.bf16.msra.mxu0 %v2764_v42  ;;  %1622 = vmatpush.bf16.msrb.mxu1 %v3048_v54  ;;  %v2681_v42 = vld [vmem:[#allocation5 + $0x38] sm:$0xf0]  ;;  %v2972_v38 = vor.u32 %v3926_v30, %v2969_v31  ;;  %v3535_v30 = vld [vmem:[#allocation7 + $0xe0] sm:$0xf]  ;;  %v4070_v31 = vld [vmem:[#allocation7 + $0xe4] sm:$0xf0] }
  0xf0   :  { %1630 = vmatpush.bf16.msra.mxu2 %v3240_v46  ;;  %v3036_v46 = vor.u32 %v3942_v33, %v3033_v34  ;;  %v3145_v54 = vld [vmem:[#allocation5 + $0x3d8] sm:$0xf0]  ;;  %v3958_v33 = vld [vmem:[#allocation5 + $0x36c] sm:$0xf] }
  0xf1   :  { %1642 = vmatpush.bf16.msra.mxu3 %v3368_v50  ;;  %v2684_v50 = vor.u32 %v3854_v39, %v2681_v42  ;;  %v3148_v63 = vor.u32 %v3970_v53, %v3145_v54  ;;  %v3097_v34 = vld [vmem:[#allocation5 + $0x378] sm:$0xf0]  ;;  %v4030_v53 = vld [vmem:[#allocation5 + $0x5ac] sm:$0xf] }
  0xf2   :  { %1623 = vmatmul.f32.vlgmr.msrb.gmra.mxu1 %v4429_v41  ;;  %v3241_v39 = vld [vmem:[#allocation5 + $0x498] sm:$0xf0]  ;;  %v3100_v43 = vor.u32 %v3958_v33, %v3097_v34  ;;  %v4018_v33 = vld [vmem:[#allocation5 + $0x54c] sm:$0xf] }
  0xf3   :  { %1653 = vmatpush.bf16.msra.mxu0 %v2748_v58  ;;  %1663 = vmatpush.bf16.msra.mxu1 %v2908_v59  ;;  %v3890_v58 = vld [vmem:[#allocation5 + $0x14c] sm:$0xf]  ;;  %v2825_v59 = vld [vmem:[#allocation5 + $0x158] sm:$0xf0] }
  0xf4   :  { %1631 = vmatpush.bf16.msra.mxu2 %v3224_v61  ;;  %v4006_v61 = vld [vmem:[#allocation5 + $0x4ec] sm:$0xf]  ;;  %v2828_v3 = vor.u32 %v3890_v58, %v2825_v59  ;;  %v3401_v42 = vld [vmem:[#allocation5 + $0x5d8] sm:$0xf0] }
  0xf5   :  { %1643 = vmatpush.bf16.msra.mxu3 %v3352_v1  ;;  %v3001_v1 = vld [vmem:[#allocation5 + $0x2b8] sm:$0xf0]  ;;  %v3950_v59 = vld [vmem:[#allocation5 + $0x32c] sm:$0xf] }
  0xf6   :  { %v3385_v54 = vld [vmem:[#allocation5 + $0x5b8] sm:$0xf0] }
  0xf7   :  { %1654 = vmatpush.bf16.msra.mxu0 %v2732_v6  ;;  %1664 = vmatpush.bf16.msra.mxu1 %v2892_v7  ;;  %v3292_v6 = vor.u32 %v4006_v61, %v3289_v62  ;;  %v3886_v7 = vld [vmem:[#allocation5 + $0x12c] sm:$0xf]  ;;  %v2937_v58 = vld [vmem:[#allocation5 + $0x238] sm:$0xf0]  ;;  %v3388_v62 = vor.u32 %v4030_v53, %v3385_v54 }
  0xf8   :  { %1632 = vmatpush.bf16.msra.mxu2 %v3208_v9  ;;  %v3004_v9 = vor.u32 %v3934_v0, %v3001_v1  ;;  %v2812_v17 = vor.u32 %v3886_v7, %v2809_v8  ;;  %v2940_v0 = vor.u32 %v3918_v57, %v2937_v58  ;;  %v3209_v1 = vld [vmem:[#allocation5 + $0x458] sm:$0xf0]  ;;  %v3479_v8 = vld [vmem:[#allocation7 + $0x70] sm:$0xf]  ;;  %v4010_v53 = vld [vmem:[#allocation5 + $0x50c] sm:$0xf] }
  0xf9   :  { %1644 = vmatpush.bf16.msra.mxu3 %v3336_v14  ;;  %v3930_v14 = vld [vmem:[#allocation5 + $0x28c] sm:$0xf]  ;;  %v3049_v7 = vld [vmem:[#allocation5 + $0x318] sm:$0xf0]  ;;  %v4048_v57 = vld [vmem:[#allocation7 + $0x34] sm:$0xf0] }
  0xfa   :  { %v2988_v25 = vor.u32 %v3930_v14, %v2985_v15  ;;  %v3543_v14 = vld [vmem:[#allocation7 + $0xf0] sm:$0xf]  ;;  %v4072_v15 = vld [vmem:[#allocation7 + $0xf4] sm:$0xf0]  ;;  %v3337_v34 = vld [vmem:[#allocation5 + $0x558] sm:$0xf0] }
  0xfb   :  { %1655 = vmatpush.bf16.msra.mxu0 %v2716_v21  ;;  %1665 = vmatpush.bf16.msra.mxu1 %v2876_v22  ;;  %v3276_v21 = vor.u32 %v4002_v10, %v3273_v12  ;;  %v3882_v22 = vld [vmem:[#allocation5 + $0x10c] sm:$0xf]  ;;  %v3305_v54 = vld [vmem:[#allocation5 + $0x518] sm:$0xf0] }
  0xfc   :  { %1633 = vmatpush.bf16.msra.mxu2 %v3192_v24  ;;  %v3998_v24 = vld [vmem:[#allocation5 + $0x4ac] sm:$0xf]  ;;  %v2796_v32 = vor.u32 %v3882_v22, %v2793_v23 }
  0xfd   :  { %1645 = vmatpush.bf16.msra.mxu3 %v3320_v28  ;;  %v3417_v28 = vld [vmem:[#allocation5 + $0x5f8] sm:$0xf0] }
  0xff   :  { %1656 = vmatpush.bf16.msra.mxu0 %v2700_v35  ;;  %1666 = vmatpush.bf16.msra.mxu1 %v2860_v36  ;;  %v3260_v35 = vor.u32 %v3998_v24, %v3257_v26  ;;  %v3420_v36 = vor.u32 %v4038_v27, %v3417_v28  ;;  %v3471_v24 = vld [vmem:[#allocation7 + $0x60] sm:$0xf]  ;;  %v3544_v26 = vor.u32 %v4072_v15, %v3543_v14 }
 0x100   :  { %1634 = vmatpush.bf16.msra.mxu2 %v3176_v40  ;;  %v4034_v40 = vld [vmem:[#allocation5 + $0x5cc] sm:$0xf] }
 0x101   :  { %1646 = vmatpush.bf16.msra.mxu3 %v3304_v45  ;;  %v3954_v45 = vld [vmem:[#allocation5 + $0x34c] sm:$0xf]  ;;  %v3404_v48 = vor.u32 %v4034_v40, %v3401_v42  ;;  %v3340_v40 = vor.u32 %v4018_v33, %v3337_v34  ;;  %v3527_v42 = vld [vmem:[#allocation7 + $0xd0] sm:$0xf]  ;;  %v4053_v33 = vld [vmem:[#allocation7 + $0x64] sm:$0xf] }
 0x103   :  { %1657 = vmatpush.bf16.msra.mxu0 %v2684_v50  ;;  %1667 = vmatpush.bf16.msra.mxu1 %v2844_v52  ;;  %v3225_v52 = vld [vmem:[#allocation5 + $0x478] sm:$0xf0] }
 0x104   :  { %1675 = vmatpush.bf16.msrb.mxu2 %v3036_v46  ;;  %1647 = vmatmul.f32.vlgmr.msra.gmra.mxu3 %v4424_v20  ;;  %v3081_v46 = vld [vmem:[#allocation5 + $0x358] sm:$0xf0]  ;;  %v3228_v61 = vor.u32 %v3990_v49, %v3225_v52  ;;  %v4066_v52 = vld [vmem:[#allocation7 + $0xc4] sm:$0xf0] }
 0x105   :  { %1687 = vmatpush.bf16.msrb.mxu3 %v3164_v47  ;;  %1635 = vmatmul.f32.vlgmr.msra.gmra.mxu2 %v4421_v16  ;;  %v3244_v47 = vor.u32 %v3994_v37, %v3241_v39  ;;  %v3084_v56 = vor.u32 %v3954_v45, %v3081_v46  ;;  %v4052_v37 = vld [vmem:[#allocation7 + $0x54] sm:$0xf0]  ;;  %v3455_v46 = vld [vmem:[#allocation7 + $0x40] sm:$0xf] }
 0x107   :  { %1658 = vmatpush.bf16.msra.mxu0 %v2668_v2  ;;  %1668 = vmatpush.bf16.msra.mxu1 %v2828_v3  ;;  %v4026_v2 = vld [vmem:[#allocation5 + $0x58c] sm:$0xf]  ;;  %v3369_v3 = vld [vmem:[#allocation5 + $0x598] sm:$0xf0] }
 0x108   :  { %1676 = vmatpush.bf16.msrb.mxu2 %v3020_v60  ;;  %v3065_v60 = vld [vmem:[#allocation5 + $0x338] sm:$0xf0]  ;;  %v3372_v12 = vor.u32 %v4026_v2, %v3369_v3 }
 0x109   :  { %1688 = vmatpush.bf16.msrb.mxu3 %v3148_v63  ;;  %v3986_v63 = vld [vmem:[#allocation5 + $0x44c] sm:$0xf]  ;;  %v3068_v4 = vor.u32 %v3950_v59, %v3065_v60  ;;  %v3308_v59 = vor.u32 %v4010_v53, %v3305_v54  ;;  %v3511_v60 = vld [vmem:[#allocation7 + $0xb0] sm:$0xf]  ;;  %v3529_v54 = vld [vmem:[#allocation7 + $0xd8] sm:$0xf0] }
 0x10a   :  { %1659 = vmatmul.f32.vlgmr.msra.gmra.mxu0 %v4410_v51  ;;  %v3922_v51 = vld [vmem:[#allocation5 + $0x24c] sm:$0xf]  ;;  %v3212_v10 = vor.u32 %v3986_v63, %v3209_v1  ;;  %v4046_v1 = vld [vmem:[#allocation7 + $0x24] sm:$0xf0] }
 0x10b   :  { %1699 = vmatpush.bf16.msrb.mxu0 %v3292_v6  ;;  %1669 = vmatpush.bf16.msra.mxu1 %v2812_v17  ;;  %v2956_v50 = vor.u32 %v3922_v51, %v2953_v44  ;;  %v3946_v6 = vld [vmem:[#allocation5 + $0x30c] sm:$0xf]  ;;  %v3321_v44 = vld [vmem:[#allocation5 + $0x538] sm:$0xf0] }
 0x10c   :  { %1677 = vmatpush.bf16.msrb.mxu2 %v3004_v9  ;;  %v4056_v9 = vld [vmem:[#allocation7 + $0x74] sm:$0xf0]  ;;  %v3052_v22 = vor.u32 %v3946_v6, %v3049_v7  ;;  %v4014_v51 = vld [vmem:[#allocation5 + $0x52c] sm:$0xf]  ;;  %v3431_v7 = vld [vmem:[#allocation7 + $0x10] sm:$0xf] }
 0x10d   :  { %1689 = vmatpush.bf16.msrb.mxu3 %v3132_v13  ;;  %v3982_v13 = vld [vmem:[#allocation5 + $0x42c] sm:$0xf]  ;;  %v3480_v23 = vor.u32 %v4056_v9, %v3479_v8  ;;  %v3324_v49 = vor.u32 %v4014_v51, %v3321_v44  ;;  %v4044_v8 = vld [vmem:[#allocation7 + $0x14] sm:$0xf0]  ;;  %v3599_v44 = vld [vmem:[#allocation7 + $0x160] sm:$0xf] }
 0x10e   :  { %v3196_v27 = vor.u32 %v3982_v13, %v3193_v18  ;;  %v4060_v13 = vld [vmem:[#allocation7 + $0x94] sm:$0xf0]  ;;  %v3432_v14 = vor.u32 %v4044_v8, %v3431_v7  ;;  %v4042_v18 = vld [vmem:[#allocation7 + $0x4] sm:$0xf0] }
 0x10f   :  { %1700 = vmatpush.bf16.msrb.mxu0 %v3276_v21  ;;  %1670 = vmatpush.bf16.msra.mxu1 %v2796_v32  ;;  %v3353_v21 = vld [vmem:[#allocation5 + $0x578] sm:$0xf0] }
 0x110   :  { %1678 = vmatpush.bf16.msrb.mxu2 %v2988_v25  ;;  %v4054_v25 = vld [vmem:[#allocation7 + $0x64] sm:$0xf0]  ;;  %v3356_v28 = vor.u32 %v4022_v19, %v3353_v21  ;;  %v3177_v32 = vld [vmem:[#allocation5 + $0x418] sm:$0xf0]  ;;  %v4055_v19 = vld [vmem:[#allocation7 + $0x74] sm:$0xf] }
 0x111   :  { %1690 = vmatpush.bf16.msrb.mxu3 %v3116_v29  ;;  %v3978_v29 = vld [vmem:[#allocation5 + $0x40c] sm:$0xf] }
 0x112   :  { %1671 = vmatmul.f32.vlgmr.msra.gmra.mxu1 %v4412_v55  ;;  %v2921_v55 = vld [vmem:[#allocation5 + $0x218] sm:$0xf0]  ;;  %v3180_v39 = vor.u32 %v3978_v29, %v3177_v32 }
 0x113   :  { %1701 = vmatpush.bf16.msrb.mxu0 %v3260_v35  ;;  %1711 = vmatpush.bf16.msrb.mxu1 %v3420_v36  ;;  %v2924_v17 = vor.u32 %v3914_v5, %v2921_v55  ;;  %v3472_v35 = vor.u32 %v4054_v25, %v3471_v24  ;;  %v3463_v36 = vld [vmem:[#allocation7 + $0x50] sm:$0xf]  ;;  %v3487_v24 = vld [vmem:[#allocation7 + $0x80] sm:$0xf]  ;;  %v4058_v25 = vld [vmem:[#allocation7 + $0x84] sm:$0xf0] }
 0x114   :  { %1679 = vmatpush.bf16.msrb.mxu2 %v2972_v38  ;;  %v3536_v38 = vor.u32 %v4070_v31, %v3535_v30  ;;  %v3464_v45 = vor.u32 %v4052_v37, %v3463_v36  ;;  %v3488_v34 = vor.u32 %v4058_v25, %v3487_v24  ;;  %v3473_v36 = vld [vmem:[#allocation7 + $0x68] sm:$0xf0]  ;;  %v4043_v24 = vld [vmem:[#allocation7 + $0x14] sm:$0xf] }
 0x115   :  { %1691 = vmatpush.bf16.msrb.mxu3 %v3100_v43  ;;  %v4068_v43 = vld [vmem:[#allocation7 + $0xd4] sm:$0xf0] }
 0x117   :  { %1702 = vmatpush.bf16.msrb.mxu0 %v3244_v47  ;;  %1712 = vmatpush.bf16.msrb.mxu1 %v3404_v48  ;;  %v4050_v47 = vld [vmem:[#allocation7 + $0x44] sm:$0xf0]  ;;  %v3528_v48 = vor.u32 %v4068_v43, %v3527_v42  ;;  %v3537_v42 = vld [vmem:[#allocation7 + $0xe8] sm:$0xf0] }
 0x118   :  { %1680 = vmatpush.bf16.msrb.mxu2 %v2956_v50  ;;  %v3519_v50 = vld [vmem:[#allocation7 + $0xc0] sm:$0xf] }
 0x119   :  { %1692 = vmatpush.bf16.msrb.mxu3 %v3084_v56  ;;  %v3456_v56 = vor.u32 %v4050_v47, %v3455_v46  ;;  %v3520_v58 = vor.u32 %v4066_v52, %v3519_v50  ;;  %v3476_v46 = vor.u32 %v4053_v33, %v3473_v36  ;;  %v4051_v47 = vld [vmem:[#allocation7 + $0x54] sm:$0xf]  ;;  %v4041_v36 = vld [vmem:[#allocation7 + $0x4] sm:$0xf] }
 0x11a   :  { %v4067_v52 = vld [vmem:[#allocation7 + $0xd4] sm:$0xf] }
 0x11b   :  { %1703 = vmatpush.bf16.msrb.mxu0 %v3228_v61  ;;  %1713 = vmatpush.bf16.msrb.mxu1 %v3388_v62  ;;  %v4064_v61 = vld [vmem:[#allocation7 + $0xb4] sm:$0xf0] }
 0x11c   :  { %1681 = vmatpush.bf16.msrb.mxu2 %v2940_v0  ;;  %v3439_v0 = vld [vmem:[#allocation7 + $0x20] sm:$0xf]  ;;  %v3512_v2 = vor.u32 %v4064_v61, %v3511_v60  ;;  %v3532_v60 = vor.u32 %v4067_v52, %v3529_v54  ;;  %v4087_v52 = vld [vmem:[#allocation7 + $0x174] sm:$0xf] }
 0x11d   :  { %1693 = vmatpush.bf16.msrb.mxu3 %v3068_v4  ;;  %v3503_v4 = vld [vmem:[#allocation7 + $0xa0] sm:$0xf]  ;;  %v3440_v6 = vor.u32 %v4046_v1, %v3439_v0  ;;  %v4082_v1 = vld [vmem:[#allocation7 + $0x144] sm:$0xf0] }
 0x11e   :  { %v3583_v0 = vld [vmem:[#allocation7 + $0x140] sm:$0xf] }
 0x11f   :  { %1704 = vmatpush.bf16.msrb.mxu0 %v3212_v10  ;;  %1714 = vmatpush.bf16.msrb.mxu1 %v3372_v12  ;;  %v3495_v12 = vld [vmem:[#allocation7 + $0x90] sm:$0xf] }
 0x120   :  { %1682 = vmatpush.bf16.msrb.mxu2 %v2924_v17  ;;  %v3423_v17 = vld [vmem:[#allocation7] sm:$0xf]  ;;  %v3496_v21 = vor.u32 %v4060_v13, %v3495_v12  ;;  %v3441_v12 = vld [vmem:[#allocation7 + $0x28] sm:$0xf0] }
 0x121   :  { %1694 = vmatpush.bf16.msrb.mxu3 %v3052_v22  ;;  %v3424_v30 = vor.u32 %v4042_v18, %v3423_v17  ;;  %v4061_v18 = vld [vmem:[#allocation7 + $0xa4] sm:$0xf] }
 0x123   :  { %1705 = vmatpush.bf16.msrb.mxu0 %v3196_v27  ;;  %1715 = vmatpush.bf16.msrb.mxu1 %v3356_v28  ;;  %v4071_v27 = vld [vmem:[#allocation7 + $0xf4] sm:$0xf]  ;;  %v3545_v28 = vld [vmem:[#allocation7 + $0xf8] sm:$0xf0] }
 0x124   :  { %2116 = vmatpush.bf16.msra.mxu2 %v3480_v23  ;;  %1695 = vmatmul.f32.vlgmr.msrb.gmra.mxu3 %v4429_v41  ;;  %v3447_v41 = vld [vmem:[#allocation7 + $0x30] sm:$0xf]  ;;  %v3481_v23 = vld [vmem:[#allocation7 + $0x78] sm:$0xf0]  ;;  %v3548_v37 = vor.u32 %v4071_v27, %v3545_v28  ;;  %v3567_v27 = vld [vmem:[#allocation7 + $0x120] sm:$0xf] }
 0x125   :  { %2128 = vmatpush.bf16.msra.mxu3 %v3544_v26  ;;  %1683 = vmatmul.f32.vlgmr.msrb.gmra.mxu2 %v4419_v11  ;;  %v4451_v11 = vld [vmem:[%s4517_s6 + $0x1] ss:$8 sm:$0xf]  ;;  %v3448_v63 = vor.u32 %v4048_v57, %v3447_v41  ;;  %v1444_v3 = vpop.f32.mrf.mxu2  ;;  %v3484_v32 = vor.u32 %v4055_v19, %v3481_v23  ;;  %v3505_v19 = vld [vmem:[#allocation7 + $0xa8] sm:$0xf0] }
 0x126   :  { %v467_v62 = vperm.slane %v4451_v11, 0  ;;  %v1456_v55 = vpop.f32.mrf.mxu3  ;;  %v4084_v41 = vld [vmem:[#allocation7 + $0x154] sm:$0xf0]  ;;  %v468_v7 = vperm.slane %v4451_v11, 1  ;;  %v4078_v28 = vld [vmem:[#allocation7 + $0x124] sm:$0xf0] }
 0x127   :  { %1706 = vmatpush.bf16.msrb.mxu0 %v3180_v39  ;;  %1716 = vmatpush.bf16.msrb.mxu1 %v3340_v40  ;;  %v1468_v15 = vpop.f32.mrf.mxu0  ;;  %v4088_v39 = vld [vmem:[#allocation7 + $0x174] sm:$0xf0]  ;;  %v4069_v40 = vld [vmem:[#allocation7 + $0xe4] sm:$0xf] }
 0x128   :  { %2117 = vmatpush.bf16.msra.mxu2 %v3472_v35  ;;  %v1445_v5 = vadd.f32 %v1444_v3, %v467_v62  ;;  %v3540_v50 = vor.u32 %v4069_v40, %v3537_v42  ;;  %v4065_v62 = vld [vmem:[#allocation7 + $0xc4] sm:$0xf]  ;;  %v4047_v3 = vld [vmem:[#allocation7 + $0x34] sm:$0xf]  ;;  %v3559_v40 = vld [vmem:[#allocation7 + $0x110] sm:$0xf] }
 0x129   :  { %2129 = vmatpush.bf16.msra.mxu3 %v3536_v38  ;;  %v3607_v38 = vld [vmem:[#allocation7 + $0x170] sm:$0xf]  ;;  %v4076_v42 = vld [vmem:[#allocation7 + $0x114] sm:$0xf0] }
 0x12a   :  { %1707 = vmatmul.f32.vlgmr.msrb.gmra.mxu0 %v4421_v16  ;;  %v4062_v16 = vld [vmem:[#allocation7 + $0xa4] sm:$0xf0]  ;;  %v1457_v10 = vadd.f32 %v1456_v55, %v1445_v5  ;;  %v3608_v43 = vor.u32 %v4088_v39, %v3607_v38  ;;  %v3584_v5 = vor.u32 %v4082_v1, %v3583_v0  ;;  %v4063_v55 = vld [vmem:[#allocation7 + $0xb4] sm:$0xf]  ;;  %v3425_v38 = vld [vmem:[#allocation7 + $0x8] sm:$0xf0] }
 0x12b   :  { %1717 = vmatpush.bf16.msrb.mxu1 %v3324_v49  ;;  %v3504_v9 = vor.u32 %v4062_v16, %v3503_v4  ;;  %v3465_v49 = vld [vmem:[#allocation7 + $0x58] sm:$0xf0]  ;;  %v3663_v1 = vld [vmem:[#allocation7 + $0x1e0] sm:$0xf] }
 0x12c   :  { %2118 = vmatpush.bf16.msra.mxu2 %v3464_v45  ;;  %v1469_v22 = vadd.f32 %v1468_v15, %v1457_v10  ;;  %v4086_v45 = vld [vmem:[#allocation7 + $0x164] sm:$0xf0]  ;;  %2140 = vmatpush.bf16.msra.mxu0 %v3608_v43  ;;  %v3468_v57 = vor.u32 %v4051_v47, %v3465_v49  ;;  %v3449_v4 = vld [vmem:[#allocation7 + $0x38] sm:$0xf0]  ;;  %v4045_v10 = vld [vmem:[#allocation7 + $0x24] sm:$0xf]  ;;  %v3428_v47 = vor.u32 %v4041_v36, %v3425_v38 }
 0x12d   :  { %2130 = vmatpush.bf16.msra.mxu3 %v3528_v48  ;;  %v1492_v26 = vpop.f32.mrf.mxu2  ;;  %v3600_v53 = vor.u32 %v4086_v45, %v3599_v44  ;;  %v4080_v15 = vld [vmem:[#allocation7 + $0x134] sm:$0xf0]  ;;  %v3444_v23 = vor.u32 %v4045_v10, %v3441_v12  ;;  %v4057_v43 = vld [vmem:[#allocation7 + $0x84] sm:$0xf]  ;;  %v3489_v44 = vld [vmem:[#allocation7 + $0x88] sm:$0xf0]  ;;  %v3560_v45 = vor.u32 %v4076_v42, %v3559_v40 }
 0x12e   :  { %v3551_v49 = vld [vmem:[#allocation7 + $0x100] sm:$0xf]  ;;  %v3492_v54 = vor.u32 %v4057_v43, %v3489_v44  ;;  %v4081_v10 = vld [vmem:[#allocation7 + $0x144] sm:$0xf]  ;;  %v3585_v12 = vld [vmem:[#allocation7 + $0x148] sm:$0xf0] }
 0x12f   :  { %1718 = vmatpush.bf16.msrb.mxu1 %v3308_v59  ;;  %v1504_v31 = vpop.f32.mrf.mxu3  ;;  %v3457_v59 = vld [vmem:[#allocation7 + $0x48] sm:$0xf0]  ;;  %v1516_v8 = vpop.f32.mrf.mxu0  ;;  %v4090_v38 = vld [vmem:[#allocation7 + $0x184] sm:$0xf0]  ;;  %v3673_v42 = vld [vmem:[#allocation7 + $0x1f8] sm:$0xf0] }
 0x130   :  { %2119 = vmatpush.bf16.msra.mxu2 %v3456_v56  ;;  %v3591_v56 = vld [vmem:[#allocation7 + $0x150] sm:$0xf]  ;;  %2141 = vmatpush.bf16.msra.mxu0 %v3600_v53  ;;  %v469_v43 = vperm.slane %v4451_v11, 2 }
 0x131   :  { %2131 = vmatpush.bf16.msra.mxu3 %v3520_v58  ;;  %v4049_v58 = vld [vmem:[#allocation7 + $0x44] sm:$0xf]  ;;  %v3592_v61 = vor.u32 %v4084_v41, %v3591_v56  ;;  %v3609_v41 = vld [vmem:[#allocation7 + $0x178] sm:$0xf0] }
 0x132   :  { %1719 = vmatmul.f32.vlgmr.msrb.gmra.mxu1 %v4424_v20  ;;  %v1480_v20 = vpop.f32.mrf.mxu1 }
 0x133   :  { %v1481_v29 = vadd.f32 %v1480_v20, %v1469_v22  ;;  %v1517_v22 = vadd.f32 %v1516_v8, %v468_v7  ;;  %v3433_v20 = vld [vmem:[#allocation7 + $0x18] sm:$0xf0]  ;;  %v4100_v7 = vld [vmem:[#allocation7 + $0x1d4] sm:$0xf0] }
 0x134   :  { %2120 = vmatpush.bf16.msra.mxu2 %v3448_v63  ;;  %v3521_v63 = vld [vmem:[#allocation7 + $0xc8] sm:$0xf0]  ;;  %2142 = vmatpush.bf16.msra.mxu0 %v3592_v61  ;;  %v4104_v61 = vld [vmem:[#allocation7 + $0x1f4] sm:$0xf0] }
 0x135   :  { %2132 = vmatpush.bf16.msra.mxu3 %v3512_v2  ;;  %v1493_v35 = vadd.f32 %v1492_v26, %v1481_v29  ;;  %v3460_v2 = vor.u32 %v4049_v58, %v3457_v59  ;;  %v3524_v16 = vor.u32 %v4065_v62, %v3521_v63  ;;  %v3508_v26 = vor.u32 %v4061_v18, %v3505_v19  ;;  %v4085_v59 = vld [vmem:[#allocation7 + $0x164] sm:$0xf]  ;;  %v3601_v63 = vld [vmem:[#allocation7 + $0x168] sm:$0xf0]  ;;  %v3647_v18 = vld [vmem:[#allocation7 + $0x1c0] sm:$0xf] }
 0x136   :  { %v3612_v58 = vor.u32 %v4087_v52, %v3609_v41  ;;  %v4077_v19 = vld [vmem:[#allocation7 + $0x124] sm:$0xf]  ;;  %v4099_v52 = vld [vmem:[#allocation7 + $0x1d4] sm:$0xf] }
 0x137   :  { %v4456_v51 = vadd.f32 %v1504_v31, %v1493_v35  ;;  %v3497_v31 = vld [vmem:[#allocation7 + $0x98] sm:$0xf0]  ;;  %v3436_v35 = vor.u32 %v4043_v24, %v3433_v20  ;;  %v4096_v24 = vld [vmem:[#allocation7 + $0x1b4] sm:$0xf0]  ;;  %v4075_v20 = vld [vmem:[#allocation7 + $0x114] sm:$0xf] }
 0x138   :  { %2121 = vmatpush.bf16.msra.mxu2 %v3440_v6  ;;  %v3513_v6 = vld [vmem:[#allocation7 + $0xb8] sm:$0xf0]  ;;  %2143 = vmatpush.bf16.msra.mxu0 %v3584_v5 }
 0x139   :  { %2133 = vmatpush.bf16.msra.mxu3 %v3504_v9  ;;  %v1723_v48 = vmax.f32 %v4456_v51, 0.0  ;;  %v3452_v9 = vor.u32 %v4047_v3, %v3449_v4  ;;  %v3516_v13 = vor.u32 %v4063_v55, %v3513_v6  ;;  %v3604_v4 = vor.u32 %v4085_v59, %v3601_v63  ;;  %v3593_v55 = vld [vmem:[#allocation7 + $0x158] sm:$0xf0]  ;;  %v3655_v6 = vld [vmem:[#allocation7 + $0x1d0] sm:$0xf] }
 0x13a   :  { %v1528_v17 = vpop.f32.mrf.mxu1  ;;  %v4098_v51 = vld [vmem:[#allocation7 + $0x1c4] sm:$0xf0] }
 0x13b   :  { %v1529_v25 = vadd.f32 %v1528_v17, %v1517_v22 }
 0x13c   :  { %2122 = vmatpush.bf16.msra.mxu2 %v3432_v14  ;;  %v3575_v14 = vld [vmem:[#allocation7 + $0x130] sm:$0xf] }
 0x13d   :  { %2134 = vmatpush.bf16.msra.mxu3 %v3496_v21  ;;  %v3576_v21 = vor.u32 %v4080_v15, %v3575_v14  ;;  %v4079_v14 = vld [vmem:[#allocation7 + $0x134] sm:$0xf]  ;;  %v3577_v15 = vld [vmem:[#allocation7 + $0x138] sm:$0xf0] }
 0x13e   :  { %v3580_v17 = vor.u32 %v4079_v14, %v3577_v15  ;;  %v3617_v14 = vld [vmem:[#allocation7 + $0x188] sm:$0xf0] }
 0x13f   :  { %2144 = vmatpush.bf16.msra.mxu0 %v3576_v21  ;;  %v3569_v21 = vld [vmem:[#allocation7 + $0x128] sm:$0xf0] }
 0x140   :  { %2123 = vmatpush.bf16.msra.mxu2 %v3424_v30  ;;  %v4059_v30 = vld [vmem:[#allocation7 + $0x94] sm:$0xf]  ;;  %v3572_v22 = vor.u32 %v4077_v19, %v3569_v21 }
 0x141   :  { %2135 = vmatpush.bf16.msra.mxu3 %v3488_v34  ;;  %v3500_v39 = vor.u32 %v4059_v30, %v3497_v31  ;;  %v4073_v31 = vld [vmem:[#allocation7 + $0x104] sm:$0xf] }
 0x143   :  { %2124 = vmatmul.f32.vlgmr.msra.gmra.mxu2 %v1723_v48 }
 0x144   :  { %2164 = vmatpush.bf16.msrb.mxu2 %v3484_v32  ;;  %v3568_v32 = vor.u32 %v4078_v28, %v3567_v27  ;;  %v3631_v28 = vld [vmem:[#allocation7 + $0x1a0] sm:$0xf] }
 0x145   :  { %2176 = vmatpush.bf16.msrb.mxu3 %v3548_v37 }
 0x146   :  { %2145 = vmatpush.bf16.msra.mxu0 %v3568_v32  ;;  %v3553_v32 = vld [vmem:[#allocation7 + $0x108] sm:$0xf0] }
 0x147   :  { %v1552_v34 = vpop.f32.mrf.mxu3 }
 0x148   :  { %2165 = vmatpush.bf16.msrb.mxu2 %v3476_v46  ;;  %v1540_v29 = vpop.f32.mrf.mxu2  ;;  %v1564_v46 = vpop.f32.mrf.mxu0 }
 0x149   :  { %2177 = vmatpush.bf16.msrb.mxu3 %v3540_v50  ;;  %v1541_v33 = vadd.f32 %v1540_v29, %v1529_v25  ;;  %v4074_v50 = vld [vmem:[#allocation7 + $0x104] sm:$0xf0] }
 0x14a   :  { %2146 = vmatpush.bf16.msra.mxu0 %v3560_v45  ;;  %v3552_v56 = vor.u32 %v4074_v50, %v3551_v49  ;;  %v4094_v29 = vld [vmem:[#allocation7 + $0x1a4] sm:$0xf0]  ;;  %v4101_v45 = vld [vmem:[#allocation7 + $0x1e4] sm:$0xf] }
 0x14b   :  { %v1553_v37 = vadd.f32 %v1552_v34, %v1541_v33  ;;  %v3632_v30 = vor.u32 %v4094_v29, %v3631_v28  ;;  %v3623_v33 = vld [vmem:[#allocation7 + $0x190] sm:$0xf]  ;;  %v3556_v34 = vor.u32 %v4073_v31, %v3553_v32  ;;  %v4119_v31 = vld [vmem:[#allocation8 + $0x74] sm:$0xf] }
 0x14c   :  { %2166 = vmatpush.bf16.msrb.mxu2 %v3468_v57  ;;  %v3735_v29 = vld [vmem:[#allocation8 + $0x70] sm:$0xf] }
 0x14d   :  { %2178 = vmatpush.bf16.msrb.mxu3 %v3532_v60  ;;  %v1565_v53 = vadd.f32 %v1564_v46, %v1553_v37  ;;  %v3671_v60 = vld [vmem:[#allocation7 + $0x1f0] sm:$0xf]  ;;  %v3615_v37 = vld [vmem:[#allocation7 + $0x180] sm:$0xf]  ;;  %v3665_v46 = vld [vmem:[#allocation7 + $0x1e8] sm:$0xf0] }
 0x14e   :  { %v3672_v0 = vor.u32 %v4104_v61, %v3671_v60  ;;  %2147 = vmatpush.bf16.msra.mxu0 %v3552_v56  ;;  %v3616_v40 = vor.u32 %v4090_v38, %v3615_v37  ;;  %v3668_v49 = vor.u32 %v4101_v45, %v3665_v46  ;;  %v4097_v60 = vld [vmem:[#allocation7 + $0x1c4] sm:$0xf]  ;;  %v3649_v61 = vld [vmem:[#allocation7 + $0x1c8] sm:$0xf0]  ;;  %v4115_v45 = vld [vmem:[#allocation8 + $0x54] sm:$0xf] }
 0x14f   :  { %v1576_v57 = vpop.f32.mrf.mxu1  ;;  %v3729_v38 = vld [vmem:[#allocation8 + $0x68] sm:$0xf0] }
 0x150   :  { %2167 = vmatpush.bf16.msrb.mxu2 %v3460_v2  ;;  %v1577_v62 = vadd.f32 %v1576_v57, %v1565_v53  ;;  %v4102_v2 = vld [vmem:[#allocation7 + $0x1e4] sm:$0xf0]  ;;  %2152 = vmatpush.bf16.msra.mxu1 %v3672_v0  ;;  %v3657_v53 = vld [vmem:[#allocation7 + $0x1d8] sm:$0xf0] }
 0x151   :  { %2179 = vmatpush.bf16.msrb.mxu3 %v3524_v16  ;;  %v4083_v16 = vld [vmem:[#allocation7 + $0x154] sm:$0xf]  ;;  %v3664_v5 = vor.u32 %v4102_v2, %v3663_v1  ;;  %v3660_v56 = vor.u32 %v4099_v52, %v3657_v53  ;;  %v3791_v53 = vld [vmem:[#allocation8 + $0xe0] sm:$0xf] }
 0x152   :  { %v1724_v3 = vmax.f32 %v1577_v62, 0.0  ;;  %2188 = vmatpush.bf16.msrb.mxu0 %v3612_v58  ;;  %v3596_v8 = vor.u32 %v4083_v16, %v3593_v55  ;;  %v3652_v62 = vor.u32 %v4097_v60, %v3649_v61  ;;  %v4095_v2 = vld [vmem:[#allocation7 + $0x1b4] sm:$0xf]  ;;  %v4113_v60 = vld [vmem:[#allocation8 + $0x44] sm:$0xf] }
 0x153   :  { %v4133_v61 = vld [vmem:[#allocation8 + $0xe4] sm:$0xf] }
 0x154   :  { %2168 = vmatpush.bf16.msrb.mxu2 %v3452_v9  ;;  %2136 = vmatmul.f32.vlgmr.msra.gmra.mxu3 %v1724_v3  ;;  %v3656_v9 = vor.u32 %v4100_v7, %v3655_v6  ;;  %v4093_v6 = vld [vmem:[#allocation7 + $0x1a4] sm:$0xf]  ;;  %v3633_v7 = vld [vmem:[#allocation7 + $0x1a8] sm:$0xf0] }
 0x155   :  { %2180 = vmatpush.bf16.msrb.mxu3 %v3516_v13  ;;  %2153 = vmatpush.bf16.msra.mxu1 %v3664_v5  ;;  %v3588_v13 = vor.u32 %v4081_v10, %v3585_v12  ;;  %v3625_v10 = vld [vmem:[#allocation7 + $0x198] sm:$0xf0] }
 0x156   :  { %2189 = vmatpush.bf16.msrb.mxu0 %v3604_v4 }
 0x158   :  { %2169 = vmatpush.bf16.msrb.mxu2 %v3444_v23  ;;  %v3639_v23 = vld [vmem:[#allocation7 + $0x1b0] sm:$0xf] }
 0x159   :  { %2181 = vmatpush.bf16.msrb.mxu3 %v3508_v26  ;;  %2154 = vmatpush.bf16.msra.mxu1 %v3656_v9  ;;  %v3640_v25 = vor.u32 %v4096_v24, %v3639_v23  ;;  %v3561_v26 = vld [vmem:[#allocation7 + $0x118] sm:$0xf0]  ;;  %v4091_v9 = vld [vmem:[#allocation7 + $0x194] sm:$0xf] }
 0x15a   :  { %2190 = vmatpush.bf16.msrb.mxu0 %v3596_v8  ;;  %v3564_v27 = vor.u32 %v4075_v20, %v3561_v26  ;;  %v3636_v8 = vor.u32 %v4093_v6, %v3633_v7  ;;  %v3628_v12 = vor.u32 %v4091_v9, %v3625_v10  ;;  %v3785_v6 = vld [vmem:[#allocation8 + $0xd8] sm:$0xf0]  ;;  %v3775_v10 = vld [vmem:[#allocation8 + $0xc0] sm:$0xf] }
 0x15c   :  { %2170 = vmatpush.bf16.msrb.mxu2 %v3436_v35  ;;  %v4092_v35 = vld [vmem:[#allocation7 + $0x194] sm:$0xf0] }
 0x15d   :  { %2182 = vmatpush.bf16.msrb.mxu3 %v3500_v39  ;;  %v3624_v36 = vor.u32 %v4092_v35, %v3623_v33  ;;  %v4103_v39 = vld [vmem:[#allocation7 + $0x1f4] sm:$0xf]  ;;  %v4118_v35 = vld [vmem:[#allocation8 + $0x64] sm:$0xf0] }
 0x15e   :  { %2191 = vmatpush.bf16.msrb.mxu0 %v3588_v13  ;;  %v3676_v44 = vor.u32 %v4103_v39, %v3673_v42  ;;  %v4089_v13 = vld [vmem:[#allocation7 + $0x184] sm:$0xf]  ;;  %v3719_v39 = vld [vmem:[#allocation8 + $0x50] sm:$0xf] }
 0x15f   :  { %v3620_v15 = vor.u32 %v4089_v13, %v3617_v14  ;;  %v3705_v13 = vld [vmem:[#allocation8 + $0x38] sm:$0xf0]  ;;  %v4129_v14 = vld [vmem:[#allocation8 + $0xc4] sm:$0xf] }
 0x160   :  { %2171 = vmatpush.bf16.msrb.mxu2 %v3428_v47 }
 0x161   :  { %2183 = vmatpush.bf16.msrb.mxu3 %v3492_v54 }
 0x162   :  { %2192 = vmatpush.bf16.msrb.mxu0 %v3580_v17  ;;  %v470_v17 = vperm.slane %v4451_v11, 3  ;;  %v3737_v11 = vld [vmem:[#allocation8 + $0x78] sm:$0xf0] }
 0x163   :  { %2172 = vmatmul.f32.vlgmr.msrb.gmra.mxu2 %v1723_v48  ;;  %v3648_v48 = vor.u32 %v4098_v51, %v3647_v18  ;;  %v3740_v33 = vor.u32 %v4119_v31, %v3737_v11  ;;  %v4108_v31 = vld [vmem:[#allocation8 + $0x14] sm:$0xf0]  ;;  %v4107_v11 = vld [vmem:[#allocation8 + $0x14] sm:$0xf] }
 0x164   :  { %2184 = vmatmul.f32.vlgmr.msrb.gmra.mxu3 %v1724_v3  ;;  %v3641_v3 = vld [vmem:[#allocation7 + $0x1b8] sm:$0xf0] }
 0x165   :  { %2155 = vmatpush.bf16.msra.mxu1 %v3648_v48  ;;  %v3644_v16 = vor.u32 %v4095_v2, %v3641_v3  ;;  %v4132_v2 = vld [vmem:[#allocation8 + $0xd4] sm:$0xf0]  ;;  %v4131_v3 = vld [vmem:[#allocation8 + $0xd4] sm:$0xf] }
 0x166   :  { %2193 = vmatpush.bf16.msrb.mxu0 %v3572_v22  ;;  %v3788_v9 = vor.u32 %v4131_v3, %v3785_v6 }
 0x167   :  { %v1600_v54 = vpop.f32.mrf.mxu3  ;;  %v1612_v57 = vpop.f32.mrf.mxu0 }
 0x168   :  { %v1588_v47 = vpop.f32.mrf.mxu2 }
 0x169   :  { %2156 = vmatpush.bf16.msra.mxu1 %v3640_v25  ;;  %v1589_v50 = vadd.f32 %v1588_v47, %v469_v43  ;;  %v3799_v43 = vld [vmem:[#allocation8 + $0xf0] sm:$0xf]  ;;  %v3721_v47 = vld [vmem:[#allocation8 + $0x58] sm:$0xf0] }
 0x16a   :  { %2194 = vmatpush.bf16.msrb.mxu0 %v3564_v27 }
 0x16b   :  { %v1601_v41 = vadd.f32 %v1600_v54, %v1589_v50  ;;  %v3801_v50 = vld [vmem:[#allocation8 + $0xf8] sm:$0xf0] }
 0x16d   :  { %2157 = vmatpush.bf16.msra.mxu1 %v3632_v30  ;;  %v1613_v59 = vadd.f32 %v1612_v57, %v1601_v41  ;;  %v4120_v30 = vld [vmem:[#allocation8 + $0x74] sm:$0xf0]  ;;  %v4114_v41 = vld [vmem:[#allocation8 + $0x44] sm:$0xf0] }
 0x16e   :  { %2195 = vmatpush.bf16.msrb.mxu0 %v3556_v34  ;;  %v3736_v32 = vor.u32 %v4120_v30, %v3735_v29  ;;  %v3727_v34 = vld [vmem:[#allocation8 + $0x60] sm:$0xf]  ;;  %v4134_v57 = vld [vmem:[#allocation8 + $0xe4] sm:$0xf0]  ;;  %v3687_v30 = vld [vmem:[#allocation8 + $0x10] sm:$0xf] }
 0x16f   :  { %v1624_v58 = vpop.f32.mrf.mxu1  ;;  %v3728_v37 = vor.u32 %v4118_v35, %v3727_v34  ;;  %v3688_v34 = vor.u32 %v4108_v31, %v3687_v30 }
 0x170   :  { %v1625_v63 = vadd.f32 %v1624_v58, %v1613_v59  ;;  %2411 = vmatpush.bf16.msra.mxu2 %v3736_v32  ;;  %v3724_v58 = vor.u32 %v4115_v45, %v3721_v47  ;;  %v3792_v59 = vor.u32 %v4134_v57, %v3791_v53  ;;  %v3761_v47 = vld [vmem:[#allocation8 + $0xa8] sm:$0xf0]  ;;  %v4123_v53 = vld [vmem:[#allocation8 + $0x94] sm:$0xf]  ;;  %v3743_v57 = vld [vmem:[#allocation8 + $0x80] sm:$0xf] }
 0x171   :  { %2158 = vmatpush.bf16.msra.mxu1 %v3624_v36  ;;  %v4117_v36 = vld [vmem:[#allocation8 + $0x64] sm:$0xf] }
 0x172   :  { %v3732_v42 = vor.u32 %v4117_v36, %v3729_v38  ;;  %v3679_v36 = vld [vmem:[#allocation8] sm:$0xf] }
 0x173   :  { %v3759_v38 = vld [vmem:[#allocation8 + $0xa0] sm:$0xf] }
 0x174   :  { %2412 = vmatpush.bf16.msra.mxu2 %v3728_v37  ;;  %v4106_v37 = vld [vmem:[#allocation8 + $0x4] sm:$0xf0] }
 0x175   :  { %2159 = vmatpush.bf16.msra.mxu1 %v3616_v40  ;;  %v4116_v40 = vld [vmem:[#allocation8 + $0x54] sm:$0xf0] }
 0x176   :  { %v3720_v54 = vor.u32 %v4116_v40, %v3719_v39  ;;  %v3680_v39 = vor.u32 %v4106_v37, %v3679_v36  ;;  %v4126_v40 = vld [vmem:[#allocation8 + $0xa4] sm:$0xf0] }
 0x178   :  { %2413 = vmatpush.bf16.msra.mxu2 %v3720_v54 }
 0x179   :  { %2200 = vmatpush.bf16.msrb.mxu1 %v3676_v44  ;;  %v4136_v44 = vld [vmem:[#allocation8 + $0xf4] sm:$0xf0] }
 0x17a   :  { %v3800_v46 = vor.u32 %v4136_v44, %v3799_v43  ;;  %v3681_v43 = vld [vmem:[#allocation8 + $0x8] sm:$0xf0]  ;;  %v3760_v44 = vor.u32 %v4126_v40, %v3759_v38  ;;  %v105_v38 = vld [vmem:[%s4517_s6 + $0x5] ss:$0 sm:$0xff] }
 0x17c   :  { %2423 = vmatpush.bf16.msra.mxu3 %v3800_v46  ;;  %v4125_v46 = vld [vmem:[#allocation8 + $0xa4] sm:$0xf] }
 0x17d   :  { %2201 = vmatpush.bf16.msrb.mxu1 %v3668_v49  ;;  %v4135_v49 = vld [vmem:[#allocation8 + $0xf4] sm:$0xf] }
 0x17e   :  { %v3804_v52 = vor.u32 %v4135_v49, %v3801_v50  ;;  %v3764_v49 = vor.u32 %v4125_v46, %v3761_v47  ;;  %v3751_v50 = vld [vmem:[#allocation8 + $0x90] sm:$0xf] }
 0x180   :  { %2424 = vmatpush.bf16.msra.mxu3 %v3792_v59  ;;  %v4121_v59 = vld [vmem:[#allocation8 + $0x84] sm:$0xf] }
 0x181   :  { %2202 = vmatpush.bf16.msrb.mxu1 %v3660_v56  ;;  %v3711_v56 = vld [vmem:[#allocation8 + $0x40] sm:$0xf] }
 0x185   :  { %2203 = vmatpush.bf16.msrb.mxu1 %v3652_v62  ;;  %v3793_v62 = vld [vmem:[#allocation8 + $0xe8] sm:$0xf0] }
 0x187   :  { %v1648_v4 = vpop.f32.mrf.mxu3  ;;  %v1660_v18 = vpop.f32.mrf.mxu0 }
 0x188   :  { %v1636_v0 = vpop.f32.mrf.mxu2  ;;  %v1661_v48 = vadd.f32 %v1660_v18, %v470_v17  ;;  %v3695_v18 = vld [vmem:[#allocation8 + $0x20] sm:$0xf] }
 0x189   :  { %v1637_v1 = vadd.f32 %v1636_v0, %v1625_v63  ;;  %2204 = vmatpush.bf16.msrb.mxu1 %v3644_v16  ;;  %v3713_v63 = vld [vmem:[#allocation8 + $0x48] sm:$0xf0]  ;;  %v3796_v0 = vor.u32 %v4133_v61, %v3793_v62  ;;  %v3703_v16 = vld [vmem:[#allocation8 + $0x30] sm:$0xf] }
 0x18a   :  { %v3716_v7 = vor.u32 %v4113_v60, %v3713_v63  ;;  %v3745_v61 = vld [vmem:[#allocation8 + $0x88] sm:$0xf0]  ;;  %v4144_v63 = vld [vmem:[%s4516_s5 + $0x38] sm:$0xff] }
 0x18b   :  { %v1649_v5 = vadd.f32 %v1648_v4, %v1637_v1  ;;  %v3783_v1 = vld [vmem:[#allocation8 + $0xd0] sm:$0xf]  ;;  %v3712_v4 = vor.u32 %v4114_v41, %v3711_v56  ;;  %v3753_v56 = vld [vmem:[#allocation8 + $0x98] sm:$0xf0]  ;;  %v3748_v62 = vor.u32 %v4121_v59, %v3745_v61 }
 0x18c   :  { %v3756_v41 = vor.u32 %v4123_v53, %v3753_v56 }
 0x18d   :  { %v1725_v55 = vmax.f32 %v1649_v5, 0.0  ;;  %2205 = vmatpush.bf16.msrb.mxu1 %v3636_v8  ;;  %v4112_v5 = vld [vmem:[#allocation8 + $0x34] sm:$0xf0]  ;;  %v4111_v8 = vld [vmem:[#allocation8 + $0x34] sm:$0xf]  ;;  %2414 = vmatpush.bf16.msra.mxu2 %v3712_v4  ;;  %v4141_v4 = vld [vmem:[%s4516_s5 + $0x20] sm:$0xff] }
 0x18e   :  { %v3704_v17 = vor.u32 %v4112_v5, %v3703_v16 }
 0x18f   :  { %2148 = vmatmul.f32.vlgmr.msra.gmra.mxu0 %v1725_v55  ;;  %v1672_v51 = vpop.f32.mrf.mxu1 }
 0x190   :  { %v1673_v19 = vadd.f32 %v1672_v51, %v1661_v48  ;;  %2435 = vmatpush.bf16.msra.mxu0 %v3740_v33  ;;  %v4110_v51 = vld [vmem:[#allocation8 + $0x24] sm:$0xf0]  ;;  %v3689_v33 = vld [vmem:[#allocation8 + $0x18] sm:$0xf0] }
 0x191   :  { %2206 = vmatpush.bf16.msrb.mxu1 %v3628_v12  ;;  %v4130_v12 = vld [vmem:[#allocation8 + $0xc4] sm:$0xf0]  ;;  %2415 = vmatpush.bf16.msra.mxu2 %v3704_v17  ;;  %v3692_v35 = vor.u32 %v4107_v11, %v3689_v33 }
 0x192   :  { %v3776_v48 = vor.u32 %v4130_v12, %v3775_v10 }
 0x194   :  { %2436 = vmatpush.bf16.msra.mxu0 %v3732_v42  ;;  %v4105_v42 = vld [vmem:[#allocation8 + $0x4] sm:$0xf] }
 0x195   :  { %2207 = vmatpush.bf16.msrb.mxu1 %v3620_v15  ;;  %v3777_v15 = vld [vmem:[#allocation8 + $0xc8] sm:$0xf0]  ;;  %v3684_v45 = vor.u32 %v4105_v42, %v3681_v43  ;;  %v4323_v43 = vmov 0  }
 0x196   :  { %4158 = vset.pattern.permute.xlu0 %v4323_v43 }
 0x197   :  { %2196 = vmatmul.f32.vlgmr.msrb.gmra.mxu0 %v1725_v55  ;;  %v3784_v55 = vor.u32 %v4132_v2, %v3783_v1  ;;  %v4142_v1 = vld [vmem:[%s4516_s5 + $0x28] sm:$0xff] }
 0x198   :  { %2437 = vmatpush.bf16.msra.mxu0 %v3724_v58  ;;  %v4122_v58 = vld [vmem:[#allocation8 + $0x84] sm:$0xf0] }
 0x199   :  { %2425 = vmatpush.bf16.msra.mxu3 %v3784_v55  ;;  %v3744_v60 = vor.u32 %v4122_v58, %v3743_v57  ;;  %v2597_v2 = vld [vmem:[%s4517_s6 + $0x2] ss:$8 sm:$0x3] }
 0x19a   :  { %v1792_v3 = vperm.slane %v2597_v2, 0 }
 0x19c   :  { %2438 = vmatpush.bf16.msra.mxu0 %v3716_v7  ;;  %v4140_v7 = vld [vmem:[%s4516_s5 + $0x18] sm:$0xff] }
 0x19d   :  { %2426 = vmatpush.bf16.msra.mxu3 %v3776_v48 }
 0x1a7   :  { %v1696_v23 = vpop.f32.mrf.mxu3  ;;  %v1708_v25 = vpop.f32.mrf.mxu0 }
 0x1a8   :  { %v1684_v21 = vpop.f32.mrf.mxu2 }
 0x1a9   :  { %v1685_v22 = vadd.f32 %v1684_v21, %v1673_v19  ;;  %v3708_v19 = vor.u32 %v4111_v8, %v3705_v13  ;;  %v4109_v21 = vld [vmem:[#allocation8 + $0x24] sm:$0xf] }
 0x1ab   :  { %v1697_v24 = vadd.f32 %v1696_v23, %v1685_v22  ;;  %v3780_v22 = vor.u32 %v4129_v14, %v3777_v15  ;;  %v3767_v23 = vld [vmem:[#allocation8 + $0xb0] sm:$0xf]  ;;  %2439 = vmatpush.bf16.msra.mxu0 %v3708_v19 }
 0x1ad   :  { %v1709_v20 = vadd.f32 %v1708_v25, %v1697_v24  ;;  %v4128_v24 = vld [vmem:[#allocation8 + $0xb4] sm:$0xf0]  ;;  %v3697_v25 = vld [vmem:[#allocation8 + $0x28] sm:$0xf0] }
 0x1ae   :  { %v3700_v29 = vor.u32 %v4109_v21, %v3697_v25 }
 0x1af   :  { %v1720_v26 = vpop.f32.mrf.mxu1 }
 0x1b0   :  { %v1721_v27 = vadd.f32 %v1720_v26, %v1709_v20  ;;  %v4127_v20 = vld [vmem:[#allocation8 + $0xb4] sm:$0xf]  ;;  %v3769_v26 = vld [vmem:[#allocation8 + $0xb8] sm:$0xf0]  ;;  %2440 = vmatpush.bf16.msra.mxu0 %v3700_v29 }
 0x1b1   :  { %v3772_v32 = vor.u32 %v4127_v20, %v3769_v26  ;;  %v4139_v20 = vld [vmem:[%s4516_s5 + $0x10] sm:$0xff]  ;;  %v4138_v26 = vld [vmem:[%s4516_s5 + $0x8] sm:$0xff] }
 0x1b2   :  { %v1726_v28 = vmax.f32 %v1721_v27, 0.0  ;;  %v3696_v27 = vor.u32 %v4110_v51, %v3695_v18 }
 0x1b4   :  { %2160 = vmatmul.f32.vlgmr.msra.gmra.mxu1 %v1726_v28  ;;  %2416 = vmatpush.bf16.msra.mxu2 %v3696_v27  ;;  %v4137_v27 = vld [vmem:[%s4516_s5] sm:$0xff] }
 0x1b5   :  { %2447 = vmatpush.bf16.msra.mxu1 %v3804_v52  ;;  %2441 = vmatpush.bf16.msra.mxu0 %v3692_v35  ;;  %v4124_v52 = vld [vmem:[#allocation8 + $0x94] sm:$0xf0]  ;;  %v104_v35 = vld [vmem:[%s4517_s6 + $0x4] ss:$0 sm:$0xff] }
 0x1b6   :  { %v3752_v54 = vor.u32 %v4124_v52, %v3751_v50 }
 0x1b8   :  { %2417 = vmatpush.bf16.msra.mxu2 %v3688_v34 }
 0x1b9   :  { %2448 = vmatpush.bf16.msra.mxu1 %v3796_v0  ;;  %2442 = vmatpush.bf16.msra.mxu0 %v3684_v45  ;;  %v4143_v0 = vld [vmem:[%s4516_s5 + $0x30] sm:$0xff] }
 0x1bc   :  { %2208 = vmatmul.f32.vlgmr.msrb.gmra.mxu1 %v1726_v28  ;;  %v3768_v28 = vor.u32 %v4128_v24, %v3767_v23  ;;  %2418 = vmatpush.bf16.msra.mxu2 %v3680_v39 }
 0x1bd   :  { %2449 = vmatpush.bf16.msra.mxu1 %v3788_v9  ;;  %v1793_v9 = vperm.slane %v2597_v2, 1 }
 0x1be   :  { %2427 = vmatpush.bf16.msra.mxu3 %v3768_v28  ;;  %v2598_v28 = vld [vmem:[%s4517_s6 + $0x3] ss:$8 sm:$0x3] }
 0x1bf   :  { %v2248_v29 = vperm.slane %v2598_v28, 1  ;;  %v2247_v50 = vperm.slane %v2598_v28, 0 }
 0x1c0   :  { %2524 = vmatpush.bf16.msrb.mxu2 %v4144_v63 }
 0x1c1   :  { %2450 = vmatpush.bf16.msra.mxu1 %v3780_v22 }
 0x1c2   :  { %2428 = vmatpush.bf16.msra.mxu3 %v3760_v44  ;;  %v106_v44 = vld [vmem:[%s4517_s6 + $0x6] ss:$0 sm:$0xff] }
 0x1c4   :  { %2525 = vmatpush.bf16.msrb.mxu2 %v4143_v0 }
 0x1c5   :  { %2451 = vmatpush.bf16.msra.mxu1 %v3772_v32 }
 0x1c6   :  { %2429 = vmatpush.bf16.msra.mxu3 %v3752_v54  ;;  %v2125_v16 = vpop.f32.mrf.mxu2 }
 0x1c7   :  { %v2126_v6 = vadd.f32 %v2125_v16, %v1792_v3 }
 0x1c8   :  { %2526 = vmatpush.bf16.msrb.mxu2 %v4142_v1 }
 0x1c9   :  { %2452 = vmatpush.bf16.msra.mxu1 %v3764_v49  ;;  %v2544_v49 = vlaneseq }
 0x1ca   :  { %2430 = vmatpush.bf16.msra.mxu3 %v3744_v60 }
 0x1cb   :  { %v2545_v52 = vand.u32 127, %v2544_v49 }
 0x1cc   :  { %2527 = vmatpush.bf16.msrb.mxu2 %v4141_v4 }
 0x1cd   :  { %2453 = vmatpush.bf16.msra.mxu1 %v3756_v41  ;;  %vm2546_vm3 = vcmp.eq.s32.totalorder %v2545_v52, 6 }
 0x1d0   :  { %2528 = vmatpush.bf16.msrb.mxu2 %v4140_v7 }
 0x1d1   :  { %2454 = vmatpush.bf16.msra.mxu1 %v3748_v62 }
 0x1d4   :  { %2529 = vmatpush.bf16.msrb.mxu2 %v4139_v20 }
 0x1d7   :  { %v2137_v5 = vpop.f32.mrf.mxu3 }
 0x1d8   :  { %v2138_v8 = vadd.f32 %v2137_v5, %v2126_v6  ;;  %2530 = vmatpush.bf16.msrb.mxu2 %v4138_v26 }
 0x1dc   :  { %2531 = vmatpush.bf16.msrb.mxu2 %v4137_v27 }
 0x1e6   :  { %v2173_v12 = vpop.f32.mrf.mxu2 }
 0x1e7   :  { %v2185_v15 = vpop.f32.mrf.mxu3  ;;  %v2174_v17 = vadd.f32 %v2173_v12, %v1793_v9 }
 0x1e9   :  { %v2186_v48 = vadd.f32 %v2185_v15, %v2174_v17 }
 0x20c   :  { %v2149_v55 = vpop.f32.mrf.mxu0 }
 0x20d   :  { %v2150_v10 = vadd.f32 %v2149_v55, %v2138_v8 }
 0x214   :  { %v2197_v51 = vpop.f32.mrf.mxu0 }
 0x215   :  { %v2198_v19 = vadd.f32 %v2197_v51, %v2186_v48 }
 0x231   :  { %v2161_v13 = vpop.f32.mrf.mxu1 }
 0x232   :  { %v2162_v14 = vadd.f32 %v2161_v13, %v2150_v10 }
 0x234   :  { %v2212_v18 = vmax.f32 %v2162_v14, 0.0 }
 0x236   :  { %2419 = vmatmul.f32.vlgmr.msra.gmra.mxu2 %v2212_v18  ;;  %2443 = vmatmul.f32.vlgmr.msra.gmra.mxu0 %v2212_v18 }
 0x239   :  { %v2209_v21 = vpop.f32.mrf.mxu1 }
 0x23a   :  { %v2210_v22 = vadd.f32 %v2209_v21, %v2198_v19 }
 0x23c   :  { %v2213_v23 = vmax.f32 %v2210_v22, 0.0 }
 0x23e   :  { %v2556_v24 = vrot.slane %v2213_v23, 6  ;;  %2431 = vmatmul.f32.vlgmr.msra.gmra.mxu3 %v2213_v23  ;;  %2455 = vmatmul.f32.vlgmr.msra.gmra.mxu1 %v2213_v23 }
 0x240   :  { %v2558_v25 = vsel %vm2557_vm1, %v2212_v18, %v2556_v24 }
 0x241   :  { %2560 = vst [vmem:[#allocation11] sm:$0xf] %v2558_v25 }
 0x242   :  { %2582 = dma.vmem_to_hbm [thread:$0]  %s2578_s9, 64, %s2580_s12, [#allocation12]  }
 0x2b3   :  { %v2444_v30 = vpop.f32.mrf.mxu0 }
 0x2b4   :  { %v2445_v31 = vadd.f32 %v2444_v30, %v2248_v29 }
 0x2b9   :  { %v2420_v34 = vpop.f32.mrf.mxu2 }
 0x2ba   :  { %v2421_v54 = vadd.f32 %v2420_v34, %v2247_v50 }
 0x2bb   :  { %v2456_v32 = vpop.f32.mrf.mxu1 }
 0x2bc   :  { %v2457_v11 = vadd.f32 %v2456_v32, %v2445_v31 }
 0x2be   :  { %v2459_v33 = vmax.f32 %v2457_v11, 0.0 }
 0x2c0   :  { %2532 = vmatmul.f32.vlgmr.msrb.gmra.mxu2 %v2459_v33 }
 0x2c1   :  { %v2432_v53 = vpop.f32.mrf.mxu3 }
 0x2c2   :  { %v2433_v56 = vadd.f32 %v2432_v53, %v2421_v54 }
 0x343   :  { %v2533_v36 = vpop.f32.mrf.mxu2 }
 0x344   :  { %v2534_v37 = vadd.f32 %v2533_v36, %v104_v35 }
 0x346   :  { %v2536_v39 = vmax.f32 %v2534_v37, 0.0 }
 0x348   :  { %v2537_v40 = vmul.f32 %v2536_v39, %v105_v38 }
 0x34a   :  { %v2539_v42 = vsel %vm2538_vm2, %v2537_v40, 0.0 }
 0x34b   :  { %2540 = vadd.xlane.f32.xlu0 %v2539_v42 }
 0x3be   :  { %v2541_v45 = vpop.xlane.xlu0 %2540 }
 0x3bf   :  { %v2542_v46 = vadd.f32 %v2541_v45, %v106_v44 }
 0x3c1   :  { %v2543_v47 = vmax.f32 %v2542_v46, 0.0 }
 0x3c3   :  { %2549 = vperm.xlu0 %4158, %v2543_v47  }
 0x435   :  { %v2550_v41 = vpop.permute.xlu0 %2549 }
 0x436   :  { %v2552_v57 = vsel %vm2546_vm3, %v2550_v41, %v2433_v56 }
 0x437   :  { %2553 = vst [vmem:[#allocation10] sm:$0x3] %v2552_v57 }
 0x438   :  { %2571 = dma.vmem_to_hbm [thread:$0]  %s2567_s16, 32, %s2569_s18, [#allocation4]  }
 0x439   :  { %4309 = dma.done.wait [#allocation4], 32  }
 0x43a   :  { %4310 = vsyncadd [#allocation4], 4294967264 }
 0x43b   :  { %4311 = dma.done.wait [#allocation12], 64  }
 0x43c   :  { %4312 = vsyncadd [#allocation12], 4294967232 }
 0x43d   :  { %2591 = vsyncpa [#allocation3], 1 }
 0x43e   :  { %2592 = vsyncpa [#allocation6], 1 }
 0x43f   :  { %2593 = vsyncpa [#allocation9], 1 }
 0x440   :  { %2594 = vsyncpa [#allocation4], 1 }
 0x441   :  { %2595 = vsyncpa [#allocation12], 1 }

</bundles_post_ra>
